<compile_context>
chip_gen: v6e
topology: v6e:2x2x1
jax: 0.10.0
libtpu: 0.0.40
codegen_flags: <defaults>
</compile_context>

<pallas_src>
import functools

import jax
import jax.numpy as jnp
from jax import lax
from jax.experimental import pallas as pl
from jax.experimental.pallas import tpu as pltpu

_LN_EPS = 1e-5
_SQRT_2_OVER_PI = 0.7978845608028654


# ----------------------------------------------------------------------------
# In-kernel math helpers
# ----------------------------------------------------------------------------
def _gelu_tanh(x):
    # tanh-form GELU: 1 EUP tanh + ~5 VPU ops (vs ~12-op erf polynomial).
    # |error| vs exact-erf nn.GELU() <= ~3e-4 per element.
    return 0.5 * x * (1.0 + jnp.tanh(_SQRT_2_OVER_PI * (x + 0.044715 * x * x * x)))


# ----------------------------------------------------------------------------
# Fused transformer-block kernel (a block of Bb batch elements per grid step)
# ----------------------------------------------------------------------------
def _transformer_block_kernel(x_ref, wqkv_ref, bqkv_ref, wo_ref, bo_ref,
                              g1_ref, be1_ref, w1_ref, b1_ref,
                              w2_ref, b2_ref, g2_ref, be2_ref,
                              o_ref, *, nhead, head_dim):
    bb, seq, d_model = x_ref.shape
    rows = bb * seq                                   # merged MXU M dimension

    def layernorm(y, g_ref, b_ref):
        m = jnp.mean(y, axis=-1, keepdims=True)
        c = y - m
        var = jnp.mean(c * c, axis=-1, keepdims=True)       # biased, as nn.LayerNorm
        return c * lax.rsqrt(var + _LN_EPS) * g_ref[...] + b_ref[...]

    x2 = x_ref[...].reshape(rows, d_model)            # (R, D) f32

    # ---------------- fused QKV projection (all Bb batch elements, one matmul) ------
    # bf16 operands on the MXU, f32 accumulate; 1/sqrt(head_dim) already folded into
    # the Q columns of wqkv/bqkv at setup (prepare_params).
    qkv = jnp.dot(x2.astype(jnp.bfloat16), wqkv_ref[...],
                  preferred_element_type=jnp.float32) + bqkv_ref[...]      # (R, 3D)
    qkv3 = qkv.reshape(bb, seq, 3 * d_model)          # rows split back per batch elem

    # ---------------- multi-head self-attention --------------------------------------
    # Heads statically unrolled (nhead small); per-head scores/PV are batched over the
    # Bb axis with the documented 'bqd,bkd->bqk' pattern, and the output projection is
    # accumulated per head (no lane-dim concatenate of head_dim-wide slabs).
    attn = jnp.zeros((rows, d_model), jnp.float32)
    for h in range(nhead):
        lo = h * head_dim
        qh = qkv3[:, :, lo:lo + head_dim]                                  # (Bb,S,hd)
        kh = qkv3[:, :, d_model + lo:d_model + lo + head_dim]
        vh = qkv3[:, :, 2 * d_model + lo:2 * d_model + lo + head_dim]
        s = jnp.einsum("bqd,bkd->bqk", qh, kh,
                       preferred_element_type=jnp.float32)                 # (Bb,S,S)
        s = s - jnp.max(s, axis=-1, keepdims=True)
        p = jnp.exp(s)
        # EUP approx reciprocal instead of a VPU divide over the (S, S) matrix.
        p = p * pl.reciprocal(jnp.sum(p, axis=-1, keepdims=True), approx=True)
        # attention-weight dropout: identity (eval mode)
        ctx = jnp.einsum("bqk,bkd->bqd", p, vh,
                         preferred_element_type=jnp.float32)               # (Bb,S,hd)
        attn = attn + jnp.dot(ctx.reshape(rows, head_dim).astype(jnp.bfloat16),
                              wo_ref[h], preferred_element_type=jnp.float32)
    attn = attn + bo_ref[...]

    x1 = layernorm(x2 + attn, g1_ref, be1_ref)        # (R, D)

    # ---------------- feed-forward ----------------------------------------------------
    hdn = jnp.dot(x1.astype(jnp.bfloat16), w1_ref[...],
                  preferred_element_type=jnp.float32) + b1_ref[...]        # (R, 4D)
    hdn = _gelu_tanh(hdn)                             # Dropout: identity (eval)
    ffn = jnp.dot(hdn.astype(jnp.bfloat16), w2_ref[...],
                  preferred_element_type=jnp.float32) + b2_ref[...]        # (R, D)
    out = layernorm(x1 + ffn, g2_ref, be2_ref)        # Dropout: identity (eval)

    o_ref[...] = out.reshape(bb, seq, d_model)


# ----------------------------------------------------------------------------
# Wrapper
# ----------------------------------------------------------------------------
def _pick_batch_block(batch, seq):
    """Rows per grid step in the ~128-512 range to fill the MXU M dimension, while
    keeping >= 2 grid steps when the batch allows it (v7x megacore: 2 TensorCores)."""
    if seq % 8 != 0:            # packed (Bb*S, D) <-> (Bb, S, D) reshapes want S % 8 == 0
        return 1
    divisors = [d for d in range(1, batch + 1) if batch % d == 0]
    cands = [d for d in divisors if d * seq <= 512] or [1]
    bb = next((d for d in cands if d * seq >= 256), cands[-1])
    if batch // bb < 2:         # keep both v7x TensorCores busy when possible
        smaller = [d for d in cands if batch // d >= 2]
        if smaller:
            bb = smaller[-1]
    return bb


def _vmem_limit_bytes():
    """Generation-aware scoped-VMEM limit: ~80% of physical per-core VMEM
    (~102 MiB on v5e/v6e with 128 MiB, ~51 MiB on v7x with 64 MiB)."""
    try:
        cap = int(pltpu.get_tpu_info().vmem_capacity_bytes)
    except Exception:           # info unavailable -> conservative default
        return 48 * 1024 * 1024
    return min(int(cap * 0.8), 112 * 1024 * 1024)


def transformer_block(params, x, *, nhead, batch_block=None):
    """x: (B, S, D) f32 -> (B, S, D) f32.  Eval-mode forward (dropout = identity).
    Expects `params` produced by `prepare_params` (bf16 weights, folded Q scale)."""
    B, S, D = x.shape
    head_dim = D // nhead
    dff = params["w1"].shape[1]

    bb = _pick_batch_block(B, S) if batch_block is None else batch_block
    nb = B // bb

    kern = functools.partial(_transformer_block_kernel, nhead=nhead, head_dim=head_dim)

    # Weights / biases / LN params: whole-array, single VMEM residency (fetched once,
    # never double-buffered across grid steps).
    wspec = pl.BlockSpec(memory_space=pltpu.MemorySpace.VMEM)
    in_specs = [pl.BlockSpec((bb, S, D), lambda i: (i, 0, 0))] + [wspec] * 12

    flops_per_b = (2 * S * D * 3 * D                       # QKV projection
                   + nhead * 2 * (2 * S * S * head_dim)    # QK^T and P@V
                   + 2 * S * D * D                         # output projection
                   + 2 * (2 * S * D * dff))                # FFN matmuls
    transcendentals = B * (nhead * S * S + S * dff)        # softmax exp + GELU tanh
    bytes_accessed = int(2 * x.size * 4 + sum(
        int(p.size) * p.dtype.itemsize for p in params.values()))

    return pl.pallas_call(
        kern,
        grid=(nb,),
        in_specs=in_specs,
        out_specs=pl.BlockSpec((bb, S, D), lambda i: (i, 0, 0)),
        out_shape=jax.ShapeDtypeStruct((B, S, D), jnp.float32),
        compiler_params=pltpu.CompilerParams(
            dimension_semantics=("parallel",),
            vmem_limit_bytes=_vmem_limit_bytes()),
        cost_estimate=pl.CostEstimate(
            flops=B * flops_per_b,
            transcendentals=transcendentals,
            bytes_accessed=bytes_accessed),
    )(x, params["wqkv"], params["bqkv"], params["wo"], params["bo"],
      params["g1"], params["be1"], params["w1"], params["b1"],
      params["w2"], params["b2"], params["g2"], params["be2"])


# ----------------------------------------------------------------------------
# Parameters (deterministic, synthetic), one-time weight prep, pure-JAX reference
# ----------------------------------------------------------------------------
def init_params(key, d_model, dff):
    """PyTorch-style f32 parameters (as the nn.Module would hold them)."""
    ks = iter(jax.random.split(key, 16))

    def w(shape, scale=0.05):
        return scale * jax.random.normal(next(ks), shape, dtype=jnp.float32)

    return {
        "wqkv": w((d_model, 3 * d_model)), "bqkv": w((1, 3 * d_model), 0.01),
        "wo":   w((d_model, d_model)),     "bo":   w((1, d_model), 0.01),
        "g1":   jnp.ones((1, d_model), jnp.float32),
        "be1":  jnp.zeros((1, d_model), jnp.float32),
        "w1":   w((d_model, dff)),         "b1":   w((1, dff), 0.01),
        "w2":   w((dff, d_model)),         "b2":   w((1, d_model), 0.01),
        "g2":   jnp.ones((1, d_model), jnp.float32),
        "be2":  jnp.zeros((1, d_model), jnp.float32),
    }


def prepare_params(raw, *, nhead):
    """One-time weight transform for the kernel (call once at setup, outside jit):
      * fold 1/sqrt(head_dim) into the Q columns of wqkv / bqkv,
      * reshape Wo to per-head (nhead, head_dim, D) slabs,
      * cast weight matrices to bf16 (MXU operands); biases / LN params stay f32."""
    d_model = raw["wqkv"].shape[0]
    hd = d_model // nhead
    scale = 1.0 / float(hd) ** 0.5
    col_scale = jnp.concatenate(
        [jnp.full((d_model,), scale, jnp.float32), jnp.ones((2 * d_model,), jnp.float32)])
    return {
        "wqkv": (raw["wqkv"] * col_scale[None, :]).astype(jnp.bfloat16),
        "bqkv": raw["bqkv"] * col_scale[None, :],
        "wo":   raw["wo"].reshape(nhead, hd, d_model).astype(jnp.bfloat16),
        "bo":   raw["bo"],
        "g1":   raw["g1"], "be1": raw["be1"],
        "w1":   raw["w1"].astype(jnp.bfloat16), "b1": raw["b1"],
        "w2":   raw["w2"].astype(jnp.bfloat16), "b2": raw["b2"],
        "g2":   raw["g2"], "be2": raw["be2"],
    }


def _reference_forward(raw, x, *, nhead):
    """Plain-JAX reference of the PyTorch block in eval mode (dropout = identity).
    Uses the kernel's documented compute policy (bf16 weights on the MXU, f32
    accumulate) but exact-erf GELU and an exact softmax divide, so it also bounds the
    kernel's tanh-GELU / approx-reciprocal / scale-folding error."""
    B, S, D = x.shape
    hd = D // nhead

    def mm(a, w, b):
        return jnp.dot(a.astype(jnp.bfloat16), w.astype(jnp.bfloat16),
                       preferred_element_type=jnp.float32) + b

    def ln(y, g, b):
        m = jnp.mean(y, -1, keepdims=True)
        v = jnp.mean((y - m) ** 2, -1, keepdims=True)
        return (y - m) * lax.rsqrt(v + _LN_EPS) * g + b

    qkv = mm(x.reshape(B * S, D), raw["wqkv"], raw["bqkv"]).reshape(B, S, 3 * D)
    q, k, v = qkv[..., :D], qkv[..., D:2 * D], qkv[..., 2 * D:]
    q = q.reshape(B, S, nhead, hd).transpose(0, 2, 1, 3)
    k = k.reshape(B, S, nhead, hd).transpose(0, 2, 1, 3)
    v = v.reshape(B, S, nhead, hd).transpose(0, 2, 1, 3)
    s = jnp.einsum("bnqd,bnkd->bnqk", q, k,
                   preferred_element_type=jnp.float32) / jnp.sqrt(float(hd))
    p = jax.nn.softmax(s, axis=-1)
    ctx = jnp.einsum("bnqk,bnkd->bnqd", p, v, preferred_element_type=jnp.float32)
    ctx = ctx.transpose(0, 2, 1, 3).reshape(B * S, D)
    attn = mm(ctx, raw["wo"], raw["bo"]).reshape(B, S, D)
    x1 = ln(x + attn, raw["g1"], raw["be1"])
    h = mm(x1.reshape(B * S, D), raw["w1"], raw["b1"])
    h = jax.nn.gelu(h, approximate=False)
    f = mm(h, raw["w2"], raw["b2"]).reshape(B, S, D)
    return ln(x1 + f, raw["g2"], raw["be2"])


# ----------------------------------------------------------------------------
if __name__ == "__main__":
    B, S, D_MODEL, NHEAD = 2, 16, 128, 4          # head_dim = 32, d_ff = 512

    key = jax.random.PRNGKey(0)
    pkey, xkey = jax.random.split(key)
    raw_params = init_params(pkey, D_MODEL, 4 * D_MODEL)
    params = prepare_params(raw_params, nhead=NHEAD)     # one-time weight transform
    x = jax.random.normal(xkey, (B, S, D_MODEL), dtype=jnp.float32)

    fwd = jax.jit(functools.partial(transformer_block, nhead=NHEAD))
    out = fwd(params, x)
    jax.block_until_ready(out)

    ref = jax.jit(functools.partial(_reference_forward, nhead=NHEAD))(raw_params, x)
    jax.block_until_ready(ref)

    assert out.shape == (B, S, D_MODEL)
    assert bool(jnp.all(jnp.isfinite(out)))
    max_diff = float(jnp.max(jnp.abs(out - ref)))
    assert bool(jnp.allclose(out, ref, atol=3e-2, rtol=3e-2)), \
        f"max abs diff {max_diff}"
    print("KERNEL_OK")
</pallas_src>

<mosaic_0001>
module attributes {stable_mosaic.version = 11 : i64} {
  func.func @_transformer_block_kernel(%arg0: i32, %arg1: memref<1x16x128xf32, #tpu.memory_space<vmem>>, %arg2: memref<128x384xbf16, #tpu.memory_space<vmem>>, %arg3: memref<1x384xf32, #tpu.memory_space<vmem>>, %arg4: memref<4x32x128xbf16, #tpu.memory_space<vmem>>, %arg5: memref<1x128xf32, #tpu.memory_space<vmem>>, %arg6: memref<1x128xf32, #tpu.memory_space<vmem>>, %arg7: memref<1x128xf32, #tpu.memory_space<vmem>>, %arg8: memref<128x512xbf16, #tpu.memory_space<vmem>>, %arg9: memref<1x512xf32, #tpu.memory_space<vmem>>, %arg10: memref<512x128xbf16, #tpu.memory_space<vmem>>, %arg11: memref<1x128xf32, #tpu.memory_space<vmem>>, %arg12: memref<1x128xf32, #tpu.memory_space<vmem>>, %arg13: memref<1x128xf32, #tpu.memory_space<vmem>>, %arg14: memref<1x16x128xf32, #tpu.memory_space<vmem>>) attributes {dimension_semantics = [#tpu.dimension_semantics<parallel>], iteration_bounds = array<i64: 2>, scalar_prefetch = 0 : i64, scratch_operands = 0 : i64, tpu.core_type = #tpu.core_type<tc>, window_params = [{transform_indices = @transform_0, window_bounds = array<i64: 1, 16, 128>}, {pipeline_mode = #tpu.pipeline_mode<synchronous>, transform_indices = @transform_1, window_bounds = array<i64: 128, 384>}, {pipeline_mode = #tpu.pipeline_mode<synchronous>, transform_indices = @transform_2, window_bounds = array<i64: 1, 384>}, {pipeline_mode = #tpu.pipeline_mode<synchronous>, transform_indices = @transform_3, window_bounds = array<i64: 4, 32, 128>}, {pipeline_mode = #tpu.pipeline_mode<synchronous>, transform_indices = @transform_4, window_bounds = array<i64: 1, 128>}, {pipeline_mode = #tpu.pipeline_mode<synchronous>, transform_indices = @transform_5, window_bounds = array<i64: 1, 128>}, {pipeline_mode = #tpu.pipeline_mode<synchronous>, transform_indices = @transform_6, window_bounds = array<i64: 1, 128>}, {pipeline_mode = #tpu.pipeline_mode<synchronous>, transform_indices = @transform_7, window_bounds = array<i64: 128, 512>}, {pipeline_mode = #tpu.pipeline_mode<synchronous>, transform_indices = @transform_8, window_bounds = array<i64: 1, 512>}, {pipeline_mode = #tpu.pipeline_mode<synchronous>, transform_indices = @transform_9, window_bounds = array<i64: 512, 128>}, {pipeline_mode = #tpu.pipeline_mode<synchronous>, transform_indices = @transform_10, window_bounds = array<i64: 1, 128>}, {pipeline_mode = #tpu.pipeline_mode<synchronous>, transform_indices = @transform_11, window_bounds = array<i64: 1, 128>}, {pipeline_mode = #tpu.pipeline_mode<synchronous>, transform_indices = @transform_12, window_bounds = array<i64: 1, 128>}, {transform_indices = @transform_13, window_bounds = array<i64: 1, 16, 128>}]} {
    %c0 = arith.constant 0 : index
    %c0_0 = arith.constant 0 : index
    %c0_1 = arith.constant 0 : index
    %0 = vector.load %arg1[%c0, %c0_0, %c0_1] : memref<1x16x128xf32, #tpu.memory_space<vmem>>, vector<1x16x128xf32>
    %1 = vector.shape_cast %0 : vector<1x16x128xf32> to vector<16x128xf32>
    %2 = arith.truncf %1 : vector<16x128xf32> to vector<16x128xbf16>
    %c0_2 = arith.constant 0 : index
    %c0_3 = arith.constant 0 : index
    %3 = vector.load %arg2[%c0_2, %c0_3] : memref<128x384xbf16, #tpu.memory_space<vmem>>, vector<128x384xbf16>
    %cst = arith.constant dense<0.000000e+00> : vector<16x384xf32>
    %4 = tpu.matmul %2, %3, %cst {dimension_numbers = #tpu.dot_dimension_numbers<[1], [0], [0], [1], [0, 0, 1, 1], [], []>} : vector<16x128xbf16>, vector<128x384xbf16>, vector<16x384xf32> -> vector<16x384xf32>
    %c0_4 = arith.constant 0 : index
    %c0_5 = arith.constant 0 : index
    %5 = vector.load %arg3[%c0_4, %c0_5] : memref<1x384xf32, #tpu.memory_space<vmem>>, vector<1x384xf32>
    %6 = vector.broadcast %5 : vector<1x384xf32> to vector<16x384xf32>
    %7 = arith.addf %4, %6 : vector<16x384xf32>
    %8 = vector.shape_cast %7 : vector<16x384xf32> to vector<1x16x384xf32>
    %cst_6 = arith.constant 0.000000e+00 : f32
    %9 = vector.broadcast %cst_6 : f32 to vector<16x128xf32>
    %10 = vector.extract_strided_slice %8 {offsets = [0, 0, 0], sizes = [1, 16, 32], strides = [1, 1, 1]} : vector<1x16x384xf32> to vector<1x16x32xf32>
    %11 = vector.extract_strided_slice %8 {offsets = [0, 0, 128], sizes = [1, 16, 32], strides = [1, 1, 1]} : vector<1x16x384xf32> to vector<1x16x32xf32>
    %12 = vector.extract_strided_slice %8 {offsets = [0, 0, 256], sizes = [1, 16, 32], strides = [1, 1, 1]} : vector<1x16x384xf32> to vector<1x16x32xf32>
    "tpu.trace_start"() <{level = 10 : i32, message = "bqd,bkd->bqk"}> : () -> ()
    %cst_7 = arith.constant dense<0.000000e+00> : vector<1x16x16xf32>
    %13 = tpu.matmul %10, %11, %cst_7 {dimension_numbers = #tpu.dot_dimension_numbers<[2], [2], [1], [1], [0, 0, 0, 1, 1, 1], [0], [0]>} : vector<1x16x32xf32>, vector<1x16x32xf32>, vector<1x16x16xf32> -> vector<1x16x16xf32>
    "tpu.trace_stop"() : () -> ()
    %cst_8 = arith.constant dense<0xFF800000> : vector<1x16xf32>
    %14 = vector.multi_reduction <maximumf>, %13, %cst_8 [2] : vector<1x16x16xf32> to vector<1x16xf32>
    %15 = vector.shape_cast %14 : vector<1x16xf32> to vector<1x16x1xf32>
    %16 = vector.broadcast %15 : vector<1x16x1xf32> to vector<1x16x16xf32>
    %17 = arith.subf %13, %16 : vector<1x16x16xf32>
    %18 = math.exp %17 : vector<1x16x16xf32>
    %cst_9 = arith.constant dense<0.000000e+00> : vector<1x16xf32>
    %19 = vector.multi_reduction <add>, %18, %cst_9 [2] : vector<1x16x16xf32> to vector<1x16xf32>
    %20 = vector.shape_cast %19 : vector<1x16xf32> to vector<1x16x1xf32>
    %21 = tpu.reciprocal %20 {approx = true} : vector<1x16x1xf32> -> vector<1x16x1xf32>
    %22 = vector.broadcast %21 : vector<1x16x1xf32> to vector<1x16x16xf32>
    %23 = arith.mulf %18, %22 : vector<1x16x16xf32>
    "tpu.trace_start"() <{level = 10 : i32, message = "bqk,bkd->bqd"}> : () -> ()
    %cst_10 = arith.constant dense<0.000000e+00> : vector<1x16x32xf32>
    %24 = tpu.matmul %23, %12, %cst_10 {dimension_numbers = #tpu.dot_dimension_numbers<[2], [1], [1], [2], [0, 0, 0, 1, 1, 2], [0], [0]>} : vector<1x16x16xf32>, vector<1x16x32xf32>, vector<1x16x32xf32> -> vector<1x16x32xf32>
    "tpu.trace_stop"() : () -> ()
    %25 = vector.shape_cast %24 : vector<1x16x32xf32> to vector<16x32xf32>
    %26 = arith.truncf %25 : vector<16x32xf32> to vector<16x32xbf16>
    %c0_11 = arith.constant 0 : index
    %c0_12 = arith.constant 0 : index
    %c0_13 = arith.constant 0 : index
    %27 = vector.load %arg4[%c0_11, %c0_12, %c0_13] : memref<4x32x128xbf16, #tpu.memory_space<vmem>>, vector<1x32x128xbf16>
    %28 = vector.shape_cast %27 : vector<1x32x128xbf16> to vector<32x128xbf16>
    %cst_14 = arith.constant dense<0.000000e+00> : vector<16x128xf32>
    %29 = tpu.matmul %26, %28, %cst_14 {dimension_numbers = #tpu.dot_dimension_numbers<[1], [0], [0], [1], [0, 0, 1, 1], [], []>} : vector<16x32xbf16>, vector<32x128xbf16>, vector<16x128xf32> -> vector<16x128xf32>
    %30 = arith.addf %9, %29 : vector<16x128xf32>
    %31 = vector.extract_strided_slice %8 {offsets = [0, 0, 32], sizes = [1, 16, 32], strides = [1, 1, 1]} : vector<1x16x384xf32> to vector<1x16x32xf32>
    %32 = vector.extract_strided_slice %8 {offsets = [0, 0, 160], sizes = [1, 16, 32], strides = [1, 1, 1]} : vector<1x16x384xf32> to vector<1x16x32xf32>
    %33 = vector.extract_strided_slice %8 {offsets = [0, 0, 288], sizes = [1, 16, 32], strides = [1, 1, 1]} : vector<1x16x384xf32> to vector<1x16x32xf32>
    "tpu.trace_start"() <{level = 10 : i32, message = "bqd,bkd->bqk"}> : () -> ()
    %cst_15 = arith.constant dense<0.000000e+00> : vector<1x16x16xf32>
    %34 = tpu.matmul %31, %32, %cst_15 {dimension_numbers = #tpu.dot_dimension_numbers<[2], [2], [1], [1], [0, 0, 0, 1, 1, 1], [0], [0]>} : vector<1x16x32xf32>, vector<1x16x32xf32>, vector<1x16x16xf32> -> vector<1x16x16xf32>
    "tpu.trace_stop"() : () -> ()
    %cst_16 = arith.constant dense<0xFF800000> : vector<1x16xf32>
    %35 = vector.multi_reduction <maximumf>, %34, %cst_16 [2] : vector<1x16x16xf32> to vector<1x16xf32>
    %36 = vector.shape_cast %35 : vector<1x16xf32> to vector<1x16x1xf32>
    %37 = vector.broadcast %36 : vector<1x16x1xf32> to vector<1x16x16xf32>
    %38 = arith.subf %34, %37 : vector<1x16x16xf32>
    %39 = math.exp %38 : vector<1x16x16xf32>
    %cst_17 = arith.constant dense<0.000000e+00> : vector<1x16xf32>
    %40 = vector.multi_reduction <add>, %39, %cst_17 [2] : vector<1x16x16xf32> to vector<1x16xf32>
    %41 = vector.shape_cast %40 : vector<1x16xf32> to vector<1x16x1xf32>
    %42 = tpu.reciprocal %41 {approx = true} : vector<1x16x1xf32> -> vector<1x16x1xf32>
    %43 = vector.broadcast %42 : vector<1x16x1xf32> to vector<1x16x16xf32>
    %44 = arith.mulf %39, %43 : vector<1x16x16xf32>
    "tpu.trace_start"() <{level = 10 : i32, message = "bqk,bkd->bqd"}> : () -> ()
    %cst_18 = arith.constant dense<0.000000e+00> : vector<1x16x32xf32>
    %45 = tpu.matmul %44, %33, %cst_18 {dimension_numbers = #tpu.dot_dimension_numbers<[2], [1], [1], [2], [0, 0, 0, 1, 1, 2], [0], [0]>} : vector<1x16x16xf32>, vector<1x16x32xf32>, vector<1x16x32xf32> -> vector<1x16x32xf32>
    "tpu.trace_stop"() : () -> ()
    %46 = vector.shape_cast %45 : vector<1x16x32xf32> to vector<16x32xf32>
    %47 = arith.truncf %46 : vector<16x32xf32> to vector<16x32xbf16>
    %c1 = arith.constant 1 : index
    %c0_19 = arith.constant 0 : index
    %c0_20 = arith.constant 0 : index
    %48 = vector.load %arg4[%c1, %c0_19, %c0_20] : memref<4x32x128xbf16, #tpu.memory_space<vmem>>, vector<1x32x128xbf16>
    %49 = vector.shape_cast %48 : vector<1x32x128xbf16> to vector<32x128xbf16>
    %cst_21 = arith.constant dense<0.000000e+00> : vector<16x128xf32>
    %50 = tpu.matmul %47, %49, %cst_21 {dimension_numbers = #tpu.dot_dimension_numbers<[1], [0], [0], [1], [0, 0, 1, 1], [], []>} : vector<16x32xbf16>, vector<32x128xbf16>, vector<16x128xf32> -> vector<16x128xf32>
    %51 = arith.addf %30, %50 : vector<16x128xf32>
    %52 = vector.extract_strided_slice %8 {offsets = [0, 0, 64], sizes = [1, 16, 32], strides = [1, 1, 1]} : vector<1x16x384xf32> to vector<1x16x32xf32>
    %53 = vector.extract_strided_slice %8 {offsets = [0, 0, 192], sizes = [1, 16, 32], strides = [1, 1, 1]} : vector<1x16x384xf32> to vector<1x16x32xf32>
    %54 = vector.extract_strided_slice %8 {offsets = [0, 0, 320], sizes = [1, 16, 32], strides = [1, 1, 1]} : vector<1x16x384xf32> to vector<1x16x32xf32>
    "tpu.trace_start"() <{level = 10 : i32, message = "bqd,bkd->bqk"}> : () -> ()
    %cst_22 = arith.constant dense<0.000000e+00> : vector<1x16x16xf32>
    %55 = tpu.matmul %52, %53, %cst_22 {dimension_numbers = #tpu.dot_dimension_numbers<[2], [2], [1], [1], [0, 0, 0, 1, 1, 1], [0], [0]>} : vector<1x16x32xf32>, vector<1x16x32xf32>, vector<1x16x16xf32> -> vector<1x16x16xf32>
    "tpu.trace_stop"() : () -> ()
    %cst_23 = arith.constant dense<0xFF800000> : vector<1x16xf32>
    %56 = vector.multi_reduction <maximumf>, %55, %cst_23 [2] : vector<1x16x16xf32> to vector<1x16xf32>
    %57 = vector.shape_cast %56 : vector<1x16xf32> to vector<1x16x1xf32>
    %58 = vector.broadcast %57 : vector<1x16x1xf32> to vector<1x16x16xf32>
    %59 = arith.subf %55, %58 : vector<1x16x16xf32>
    %60 = math.exp %59 : vector<1x16x16xf32>
    %cst_24 = arith.constant dense<0.000000e+00> : vector<1x16xf32>
    %61 = vector.multi_reduction <add>, %60, %cst_24 [2] : vector<1x16x16xf32> to vector<1x16xf32>
    %62 = vector.shape_cast %61 : vector<1x16xf32> to vector<1x16x1xf32>
    %63 = tpu.reciprocal %62 {approx = true} : vector<1x16x1xf32> -> vector<1x16x1xf32>
    %64 = vector.broadcast %63 : vector<1x16x1xf32> to vector<1x16x16xf32>
    %65 = arith.mulf %60, %64 : vector<1x16x16xf32>
    "tpu.trace_start"() <{level = 10 : i32, message = "bqk,bkd->bqd"}> : () -> ()
    %cst_25 = arith.constant dense<0.000000e+00> : vector<1x16x32xf32>
    %66 = tpu.matmul %65, %54, %cst_25 {dimension_numbers = #tpu.dot_dimension_numbers<[2], [1], [1], [2], [0, 0, 0, 1, 1, 2], [0], [0]>} : vector<1x16x16xf32>, vector<1x16x32xf32>, vector<1x16x32xf32> -> vector<1x16x32xf32>
    "tpu.trace_stop"() : () -> ()
    %67 = vector.shape_cast %66 : vector<1x16x32xf32> to vector<16x32xf32>
    %68 = arith.truncf %67 : vector<16x32xf32> to vector<16x32xbf16>
    %c2 = arith.constant 2 : index
    %c0_26 = arith.constant 0 : index
    %c0_27 = arith.constant 0 : index
    %69 = vector.load %arg4[%c2, %c0_26, %c0_27] : memref<4x32x128xbf16, #tpu.memory_space<vmem>>, vector<1x32x128xbf16>
    %70 = vector.shape_cast %69 : vector<1x32x128xbf16> to vector<32x128xbf16>
    %cst_28 = arith.constant dense<0.000000e+00> : vector<16x128xf32>
    %71 = tpu.matmul %68, %70, %cst_28 {dimension_numbers = #tpu.dot_dimension_numbers<[1], [0], [0], [1], [0, 0, 1, 1], [], []>} : vector<16x32xbf16>, vector<32x128xbf16>, vector<16x128xf32> -> vector<16x128xf32>
    %72 = arith.addf %51, %71 : vector<16x128xf32>
    %73 = vector.extract_strided_slice %8 {offsets = [0, 0, 96], sizes = [1, 16, 32], strides = [1, 1, 1]} : vector<1x16x384xf32> to vector<1x16x32xf32>
    %74 = vector.extract_strided_slice %8 {offsets = [0, 0, 224], sizes = [1, 16, 32], strides = [1, 1, 1]} : vector<1x16x384xf32> to vector<1x16x32xf32>
    %75 = vector.extract_strided_slice %8 {offsets = [0, 0, 352], sizes = [1, 16, 32], strides = [1, 1, 1]} : vector<1x16x384xf32> to vector<1x16x32xf32>
    "tpu.trace_start"() <{level = 10 : i32, message = "bqd,bkd->bqk"}> : () -> ()
    %cst_29 = arith.constant dense<0.000000e+00> : vector<1x16x16xf32>
    %76 = tpu.matmul %73, %74, %cst_29 {dimension_numbers = #tpu.dot_dimension_numbers<[2], [2], [1], [1], [0, 0, 0, 1, 1, 1], [0], [0]>} : vector<1x16x32xf32>, vector<1x16x32xf32>, vector<1x16x16xf32> -> vector<1x16x16xf32>
    "tpu.trace_stop"() : () -> ()
    %cst_30 = arith.constant dense<0xFF800000> : vector<1x16xf32>
    %77 = vector.multi_reduction <maximumf>, %76, %cst_30 [2] : vector<1x16x16xf32> to vector<1x16xf32>
    %78 = vector.shape_cast %77 : vector<1x16xf32> to vector<1x16x1xf32>
    %79 = vector.broadcast %78 : vector<1x16x1xf32> to vector<1x16x16xf32>
    %80 = arith.subf %76, %79 : vector<1x16x16xf32>
    %81 = math.exp %80 : vector<1x16x16xf32>
    %cst_31 = arith.constant dense<0.000000e+00> : vector<1x16xf32>
    %82 = vector.multi_reduction <add>, %81, %cst_31 [2] : vector<1x16x16xf32> to vector<1x16xf32>
    %83 = vector.shape_cast %82 : vector<1x16xf32> to vector<1x16x1xf32>
    %84 = tpu.reciprocal %83 {approx = true} : vector<1x16x1xf32> -> vector<1x16x1xf32>
    %85 = vector.broadcast %84 : vector<1x16x1xf32> to vector<1x16x16xf32>
    %86 = arith.mulf %81, %85 : vector<1x16x16xf32>
    "tpu.trace_start"() <{level = 10 : i32, message = "bqk,bkd->bqd"}> : () -> ()
    %cst_32 = arith.constant dense<0.000000e+00> : vector<1x16x32xf32>
    %87 = tpu.matmul %86, %75, %cst_32 {dimension_numbers = #tpu.dot_dimension_numbers<[2], [1], [1], [2], [0, 0, 0, 1, 1, 2], [0], [0]>} : vector<1x16x16xf32>, vector<1x16x32xf32>, vector<1x16x32xf32> -> vector<1x16x32xf32>
    "tpu.trace_stop"() : () -> ()
    %88 = vector.shape_cast %87 : vector<1x16x32xf32> to vector<16x32xf32>
    %89 = arith.truncf %88 : vector<16x32xf32> to vector<16x32xbf16>
    %c3 = arith.constant 3 : index
    %c0_33 = arith.constant 0 : index
    %c0_34 = arith.constant 0 : index
    %90 = vector.load %arg4[%c3, %c0_33, %c0_34] : memref<4x32x128xbf16, #tpu.memory_space<vmem>>, vector<1x32x128xbf16>
    %91 = vector.shape_cast %90 : vector<1x32x128xbf16> to vector<32x128xbf16>
    %cst_35 = arith.constant dense<0.000000e+00> : vector<16x128xf32>
    %92 = tpu.matmul %89, %91, %cst_35 {dimension_numbers = #tpu.dot_dimension_numbers<[1], [0], [0], [1], [0, 0, 1, 1], [], []>} : vector<16x32xbf16>, vector<32x128xbf16>, vector<16x128xf32> -> vector<16x128xf32>
    %93 = arith.addf %72, %92 : vector<16x128xf32>
    %c0_36 = arith.constant 0 : index
    %c0_37 = arith.constant 0 : index
    %94 = vector.load %arg5[%c0_36, %c0_37] : memref<1x128xf32, #tpu.memory_space<vmem>>, vector<1x128xf32>
    %95 = vector.broadcast %94 : vector<1x128xf32> to vector<16x128xf32>
    %96 = arith.addf %93, %95 : vector<16x128xf32>
    %97 = arith.addf %1, %96 : vector<16x128xf32>
    %cst_38 = arith.constant dense<0.000000e+00> : vector<16xf32>
    %98 = vector.multi_reduction <add>, %97, %cst_38 [1] : vector<16x128xf32> to vector<16xf32>
    %99 = vector.shape_cast %98 : vector<16xf32> to vector<16x1xf32>
    %cst_39 = arith.constant 1.280000e+02 : f32
    %100 = vector.broadcast %cst_39 : f32 to vector<16x1xf32>
    %101 = arith.divf %99, %100 : vector<16x1xf32>
    %102 = vector.broadcast %101 : vector<16x1xf32> to vector<16x128xf32>
    %103 = arith.subf %97, %102 : vector<16x128xf32>
    %104 = arith.mulf %103, %103 : vector<16x128xf32>
    %cst_40 = arith.constant dense<0.000000e+00> : vector<16xf32>
    %105 = vector.multi_reduction <add>, %104, %cst_40 [1] : vector<16x128xf32> to vector<16xf32>
    %106 = vector.shape_cast %105 : vector<16xf32> to vector<16x1xf32>
    %cst_41 = arith.constant 1.280000e+02 : f32
    %107 = vector.broadcast %cst_41 : f32 to vector<16x1xf32>
    %108 = arith.divf %106, %107 : vector<16x1xf32>
    %cst_42 = arith.constant 9.99999974E-6 : f32
    %109 = vector.broadcast %cst_42 : f32 to vector<16x1xf32>
    %110 = arith.addf %108, %109 : vector<16x1xf32>
    %111 = math.rsqrt %110 : vector<16x1xf32>
    %112 = vector.broadcast %111 : vector<16x1xf32> to vector<16x128xf32>
    %113 = arith.mulf %103, %112 : vector<16x128xf32>
    %c0_43 = arith.constant 0 : index
    %c0_44 = arith.constant 0 : index
    %114 = vector.load %arg6[%c0_43, %c0_44] : memref<1x128xf32, #tpu.memory_space<vmem>>, vector<1x128xf32>
    %115 = vector.broadcast %114 : vector<1x128xf32> to vector<16x128xf32>
    %116 = arith.mulf %113, %115 : vector<16x128xf32>
    %c0_45 = arith.constant 0 : index
    %c0_46 = arith.constant 0 : index
    %117 = vector.load %arg7[%c0_45, %c0_46] : memref<1x128xf32, #tpu.memory_space<vmem>>, vector<1x128xf32>
    %118 = vector.broadcast %117 : vector<1x128xf32> to vector<16x128xf32>
    %119 = arith.addf %116, %118 : vector<16x128xf32>
    %120 = arith.truncf %119 : vector<16x128xf32> to vector<16x128xbf16>
    %c0_47 = arith.constant 0 : index
    %c0_48 = arith.constant 0 : index
    %121 = vector.load %arg8[%c0_47, %c0_48] : memref<128x512xbf16, #tpu.memory_space<vmem>>, vector<128x512xbf16>
    %cst_49 = arith.constant dense<0.000000e+00> : vector<16x512xf32>
    %122 = tpu.matmul %120, %121, %cst_49 {dimension_numbers = #tpu.dot_dimension_numbers<[1], [0], [0], [1], [0, 0, 1, 1], [], []>} : vector<16x128xbf16>, vector<128x512xbf16>, vector<16x512xf32> -> vector<16x512xf32>
    %c0_50 = arith.constant 0 : index
    %c0_51 = arith.constant 0 : index
    %123 = vector.load %arg9[%c0_50, %c0_51] : memref<1x512xf32, #tpu.memory_space<vmem>>, vector<1x512xf32>
    %124 = vector.broadcast %123 : vector<1x512xf32> to vector<16x512xf32>
    %125 = arith.addf %122, %124 : vector<16x512xf32>
    %cst_52 = arith.constant 5.000000e-01 : f32
    %126 = vector.broadcast %cst_52 : f32 to vector<16x512xf32>
    %127 = arith.mulf %126, %125 : vector<16x512xf32>
    %cst_53 = arith.constant 4.471500e-02 : f32
    %128 = vector.broadcast %cst_53 : f32 to vector<16x512xf32>
    %129 = arith.mulf %128, %125 : vector<16x512xf32>
    %130 = arith.mulf %129, %125 : vector<16x512xf32>
    %131 = arith.mulf %130, %125 : vector<16x512xf32>
    %132 = arith.addf %125, %131 : vector<16x512xf32>
    %cst_54 = arith.constant 0.797884583 : f32
    %133 = vector.broadcast %cst_54 : f32 to vector<16x512xf32>
    %134 = arith.mulf %133, %132 : vector<16x512xf32>
    %135 = math.tanh %134 : vector<16x512xf32>
    %cst_55 = arith.constant 1.000000e+00 : f32
    %136 = vector.broadcast %cst_55 : f32 to vector<16x512xf32>
    %137 = arith.addf %136, %135 : vector<16x512xf32>
    %138 = arith.mulf %127, %137 : vector<16x512xf32>
    %139 = arith.truncf %138 : vector<16x512xf32> to vector<16x512xbf16>
    %c0_56 = arith.constant 0 : index
    %c0_57 = arith.constant 0 : index
    %140 = vector.load %arg10[%c0_56, %c0_57] : memref<512x128xbf16, #tpu.memory_space<vmem>>, vector<512x128xbf16>
    %cst_58 = arith.constant dense<0.000000e+00> : vector<16x128xf32>
    %141 = tpu.matmul %139, %140, %cst_58 {dimension_numbers = #tpu.dot_dimension_numbers<[1], [0], [0], [1], [0, 0, 1, 1], [], []>} : vector<16x512xbf16>, vector<512x128xbf16>, vector<16x128xf32> -> vector<16x128xf32>
    %c0_59 = arith.constant 0 : index
    %c0_60 = arith.constant 0 : index
    %142 = vector.load %arg11[%c0_59, %c0_60] : memref<1x128xf32, #tpu.memory_space<vmem>>, vector<1x128xf32>
    %143 = vector.broadcast %142 : vector<1x128xf32> to vector<16x128xf32>
    %144 = arith.addf %141, %143 : vector<16x128xf32>
    %145 = arith.addf %119, %144 : vector<16x128xf32>
    %cst_61 = arith.constant dense<0.000000e+00> : vector<16xf32>
    %146 = vector.multi_reduction <add>, %145, %cst_61 [1] : vector<16x128xf32> to vector<16xf32>
    %147 = vector.shape_cast %146 : vector<16xf32> to vector<16x1xf32>
    %cst_62 = arith.constant 1.280000e+02 : f32
    %148 = vector.broadcast %cst_62 : f32 to vector<16x1xf32>
    %149 = arith.divf %147, %148 : vector<16x1xf32>
    %150 = vector.broadcast %149 : vector<16x1xf32> to vector<16x128xf32>
    %151 = arith.subf %145, %150 : vector<16x128xf32>
    %152 = arith.mulf %151, %151 : vector<16x128xf32>
    %cst_63 = arith.constant dense<0.000000e+00> : vector<16xf32>
    %153 = vector.multi_reduction <add>, %152, %cst_63 [1] : vector<16x128xf32> to vector<16xf32>
    %154 = vector.shape_cast %153 : vector<16xf32> to vector<16x1xf32>
    %cst_64 = arith.constant 1.280000e+02 : f32
    %155 = vector.broadcast %cst_64 : f32 to vector<16x1xf32>
    %156 = arith.divf %154, %155 : vector<16x1xf32>
    %cst_65 = arith.constant 9.99999974E-6 : f32
    %157 = vector.broadcast %cst_65 : f32 to vector<16x1xf32>
    %158 = arith.addf %156, %157 : vector<16x1xf32>
    %159 = math.rsqrt %158 : vector<16x1xf32>
    %160 = vector.broadcast %159 : vector<16x1xf32> to vector<16x128xf32>
    %161 = arith.mulf %151, %160 : vector<16x128xf32>
    %c0_66 = arith.constant 0 : index
    %c0_67 = arith.constant 0 : index
    %162 = vector.load %arg12[%c0_66, %c0_67] : memref<1x128xf32, #tpu.memory_space<vmem>>, vector<1x128xf32>
    %163 = vector.broadcast %162 : vector<1x128xf32> to vector<16x128xf32>
    %164 = arith.mulf %161, %163 : vector<16x128xf32>
    %c0_68 = arith.constant 0 : index
    %c0_69 = arith.constant 0 : index
    %165 = vector.load %arg13[%c0_68, %c0_69] : memref<1x128xf32, #tpu.memory_space<vmem>>, vector<1x128xf32>
    %166 = vector.broadcast %165 : vector<1x128xf32> to vector<16x128xf32>
    %167 = arith.addf %164, %166 : vector<16x128xf32>
    %168 = vector.shape_cast %167 : vector<16x128xf32> to vector<1x16x128xf32>
    %c0_70 = arith.constant 0 : index
    %c0_71 = arith.constant 0 : index
    %c0_72 = arith.constant 0 : index
    %169 = vector.load %arg14[%c0_70, %c0_71, %c0_72] : memref<1x16x128xf32, #tpu.memory_space<vmem>>, vector<1x16x128xf32>
    tpu.vector_store %arg14[%c0_70, %c0_71, %c0_72], %168 {strides = array<i32>} : memref<1x16x128xf32, #tpu.memory_space<vmem>>, vector<1x16x128xf32>,
    return
  }
  func.func @transform_0(%arg0: i32) -> (i32, i32, i32) {
    %c0_i32 = arith.constant 0 : i32
    %c0_i32_0 = arith.constant 0 : i32
    %c0_i32_1 = arith.constant 0 : i32
    return %arg0, %c0_i32, %c0_i32_0 : i32, i32, i32
  }
  func.func @transform_1(%arg0: i32) -> (i32, i32) {
    %c0_i32 = arith.constant 0 : i32
    %c0_i32_0 = arith.constant 0 : i32
    %c0_i32_1 = arith.constant 0 : i32
    return %c0_i32, %c0_i32_0 : i32, i32
  }
  func.func @transform_2(%arg0: i32) -> (i32, i32) {
    %c0_i32 = arith.constant 0 : i32
    %c0_i32_0 = arith.constant 0 : i32
    %c0_i32_1 = arith.constant 0 : i32
    return %c0_i32, %c0_i32_0 : i32, i32
  }
  func.func @transform_3(%arg0: i32) -> (i32, i32, i32) {
    %c0_i32 = arith.constant 0 : i32
    %c0_i32_0 = arith.constant 0 : i32
    %c0_i32_1 = arith.constant 0 : i32
    %c0_i32_2 = arith.constant 0 : i32
    return %c0_i32, %c0_i32_0, %c0_i32_1 : i32, i32, i32
  }
  func.func @transform_4(%arg0: i32) -> (i32, i32) {
    %c0_i32 = arith.constant 0 : i32
    %c0_i32_0 = arith.constant 0 : i32
    %c0_i32_1 = arith.constant 0 : i32
    return %c0_i32, %c0_i32_0 : i32, i32
  }
  func.func @transform_5(%arg0: i32) -> (i32, i32) {
    %c0_i32 = arith.constant 0 : i32
    %c0_i32_0 = arith.constant 0 : i32
    %c0_i32_1 = arith.constant 0 : i32
    return %c0_i32, %c0_i32_0 : i32, i32
  }
  func.func @transform_6(%arg0: i32) -> (i32, i32) {
    %c0_i32 = arith.constant 0 : i32
    %c0_i32_0 = arith.constant 0 : i32
    %c0_i32_1 = arith.constant 0 : i32
    return %c0_i32, %c0_i32_0 : i32, i32
  }
  func.func @transform_7(%arg0: i32) -> (i32, i32) {
    %c0_i32 = arith.constant 0 : i32
    %c0_i32_0 = arith.constant 0 : i32
    %c0_i32_1 = arith.constant 0 : i32
    return %c0_i32, %c0_i32_0 : i32, i32
  }
  func.func @transform_8(%arg0: i32) -> (i32, i32) {
    %c0_i32 = arith.constant 0 : i32
    %c0_i32_0 = arith.constant 0 : i32
    %c0_i32_1 = arith.constant 0 : i32
    return %c0_i32, %c0_i32_0 : i32, i32
  }
  func.func @transform_9(%arg0: i32) -> (i32, i32) {
    %c0_i32 = arith.constant 0 : i32
    %c0_i32_0 = arith.constant 0 : i32
    %c0_i32_1 = arith.constant 0 : i32
    return %c0_i32, %c0_i32_0 : i32, i32
  }
  func.func @transform_10(%arg0: i32) -> (i32, i32) {
    %c0_i32 = arith.constant 0 : i32
    %c0_i32_0 = arith.constant 0 : i32
    %c0_i32_1 = arith.constant 0 : i32
    return %c0_i32, %c0_i32_0 : i32, i32
  }
  func.func @transform_11(%arg0: i32) -> (i32, i32) {
    %c0_i32 = arith.constant 0 : i32
    %c0_i32_0 = arith.constant 0 : i32
    %c0_i32_1 = arith.constant 0 : i32
    return %c0_i32, %c0_i32_0 : i32, i32
  }
  func.func @transform_12(%arg0: i32) -> (i32, i32) {
    %c0_i32 = arith.constant 0 : i32
    %c0_i32_0 = arith.constant 0 : i32
    %c0_i32_1 = arith.constant 0 : i32
    return %c0_i32, %c0_i32_0 : i32, i32
  }
  func.func @transform_13(%arg0: i32) -> (i32, i32, i32) {
    %c0_i32 = arith.constant 0 : i32
    %c0_i32_0 = arith.constant 0 : i32
    %c0_i32_1 = arith.constant 0 : i32
    return %arg0, %c0_i32, %c0_i32_0 : i32, i32, i32
  }
}

</mosaic_0001>

<bundles_post_ra>
// kernel: transformer_block.1
= control target key start
LH: loop header
LB: loop body
LE: loop exit
PB: predicated region body
PF: predicated region fallthrough
CT: control target
= control target key end

     0   :  { %s4467_s0 = inlined_call_operand.hbm [shape: f32[2,16,128], index: 0, kind: input, shape index: {}]   ;;  %s4468_s1 = inlined_call_operand.hbm [shape: bf16[128,384], index: 1, kind: input, shape index: {}]   ;;  %s4469_s2 = inlined_call_operand.vmem [shape: f32[1,384], index: 2, kind: input, shape index: {}]   ;;  %s4470_s3 = inlined_call_operand.hbm [shape: bf16[4,32,128], index: 3, kind: input, shape index: {}]   ;;  %s4471_s4 = inlined_call_operand.vmem [shape: f32[1,128], index: 4, kind: input, shape index: {}]   ;;  %s4472_s5 = inlined_call_operand.vmem [shape: f32[1,128], index: 5, kind: input, shape index: {}]   ;;  %s4473_s6 = inlined_call_operand.hbm [shape: f32[1,128], index: 6, kind: input, shape index: {}]   ;;  %s4474_s7 = inlined_call_operand.hbm [shape: bf16[128,512], index: 7, kind: input, shape index: {}]   ;;  %s4475_s8 = inlined_call_operand.hbm [shape: f32[1,512], index: 8, kind: input, shape index: {}]   ;;  %s4476_s9 = inlined_call_operand.hbm [shape: bf16[512,128], index: 9, kind: input, shape index: {}]   ;;  %s4477_s10 = inlined_call_operand.hbm [shape: f32[1,128], index: 10, kind: input, shape index: {}]   ;;  %s4478_s11 = inlined_call_operand.vmem [shape: f32[1,128], index: 11, kind: input, shape index: {}]   ;;  %s4479_s12 = inlined_call_operand.hbm [shape: f32[1,128], index: 12, kind: input, shape index: {}]   ;;  %s4480_s13 = inlined_call_operand.hbm [shape: f32[2,16,128], index: 13, kind: output, shape index: {}]  }
   0x1   :  { %4488 = sst [smem:[#allocation24_spill]] %s4468_s1 }
   0x2   :  { %4489 = sst [smem:[#allocation25_spill]] %s4470_s3 }
   0x3   :  { %4490 = sst [smem:[#allocation26_spill]] %s4473_s6 }
   0x4   :  { %4491 = sst [smem:[#allocation27_spill]] %s4474_s7 }
   0x5   :  { %4492 = sst [smem:[#allocation28_spill]] %s4475_s8 }
   0x6   :  { %4493 = sst [smem:[#allocation29_spill]] %s4478_s11 }
   0x7   :  { %4494 = sst [smem:[#allocation30_spill]] %s4480_s13 }
   0x8   :  { %18 = vsyncpa [#allocation3], 0 }
   0x9   :  { %20 = vsyncpa [#allocation3 + $0x1], 0 }
   0xa   :  { %21 = vsyncpa [#allocation6], 0 }
   0xb   :  { %22 = vsyncpa [#allocation9], 0 }
   0xc   :  { %23 = vsyncpa [#allocation12], 0 }
   0xd   :  { %24 = vsyncpa [#allocation15], 0 }
   0xe   :  { %25 = vsyncpa [#allocation4], 0 }
   0xf   :  { %27 = vsyncpa [#allocation4 + $0x1], 0  ;;  %s3958_s25 = smov 0   ;;  %s3960_s26 = smov 0  }
  0x10   :  { %s3962_s27 = smov 0   ;;  %s3964_s28 = smov 0  }
  0x11 LB: > { %s3862_s29 = smov [#allocation5]   ;;  %s3979_s14 = sadd.s32 4294967295, %s3860_s28   ;;  %s3860_s28 = sphi %s3964_s28, %s4529_s28   ;;  %s3856_s27 = sphi %s3962_s27, %s4528_s27   ;;  %s3852_s26 = sphi %s3960_s26, %s4527_s26   ;;  %s3848_s25 = sphi %s3958_s25, %s4526_s25  }
  0x12   : > { %s354_s30 = sshll.u32 %s3862_s29, 4  ;;  %p2859_p0 = scmp.ge.s32.totalorder %s3860_s28, 1  ;;  %s355_s30 = int_to_ptr.vmem [resolvable:$true] %s354_s30 }
  0x13   : > { %p4482_p1 = scmp.eq.s32.totalorder %s3979_s14, 0  ;;  %p342_p2 = scmp.lt.s32.totalorder %s3860_s28, 3 }
  0x14   : > { %s3863_s16 = smov [#allocation8]   ;;  %s3864_s19 = smov [#allocation11]  }
  0x15   : > { %p3984_p3 = pnand %p2859_p0, %p342_p2  ;;  %s390_s17 = sshll.u32 %s3863_s16, 4  ;;  %s391_s17 = int_to_ptr.vmem [resolvable:$true] %s390_s17 }
  0x16   : > { %s414_s20 = sshll.u32 %s3864_s19, 4  ;;  %s3555_s22 = scalar_lea.vmem %s355_s30, 3072  ;;  %s3997_s20 = int_to_ptr.vmem [resolvable:$true] %s414_s20 }
  0x17   : > { %s4495_s15 = scalar_select %p3984_p3, 1, 0 }
  0x18   : > { %p3261_p5 = pneg %p3984_p3  ;;  %p3556_p8 = scmp.ne.s32.totalorder %s355_s30, %s3555_s22 }
  0x19   : > { %p3563_p11 = scmp.lt.s32.totalorder %s355_s30, %s355_s30  ;;  %p3564_p12 = scmp.lt.s32.totalorder %s3555_s22, %s3555_s22 }
  0x1a   : > { %p3993_p6 = pnand %p3261_p5, %p4482_p1 }
  0x1b   : > { %p3565_p13 = por %p3564_p12, %p3563_p11 }
  0x1c   : > { %p4001_p7 = pneg %p3993_p6 }
  0x1e   : > { %p3558_p9 = pnand %p3556_p8, %p4001_p7 }
  0x20   : > { %p3559_p10 = pneg %p3558_p9 }
  0x22   : > { %p3566_p0 = pnand %p3565_p13, %p3559_p10 }
  0x24   : > { %3569 = shalt.err (!%p3566_p0)
}
  0x25   : > { %s3865_s23 = smov 192   ;;  %s3866_s24 = smov 12  }
  0x26   : > { %s4498_s1 = sld [smem:[#allocation24_spill]]  ;;  %s3581_s19 = scalar_lea.vmem %s391_s17, 16 }
  0x27   : > { %p3582_p2 = scmp.ne.s32.totalorder %s391_s17, %s3581_s19  ;;  %s3588_s13 = scalar_lea.vmem %s391_s17, 32 }
  0x28   : > { %p3589_p9 = scmp.lt.s32.totalorder %s391_s17, %s391_s17  ;;  %p3590_p4 = scmp.lt.s32.totalorder %s3588_s13, %s3581_s19 }
  0x29   : > { %p3584_p5 = pnand %p3582_p2, %p4001_p7 }
  0x2a   : > { %p3591_p11 = por %p3590_p4, %p3589_p9 }
  0x2b   : > { %p3585_p8 = pneg %p3584_p5 }
  0x2c   : > { %3264 = dma.hbm_to_vmem [thread:$0]  (!%p3993_p6), %s4498_s1, 3072, %s355_s30, [#allocation6], %s3865_s23, %s3865_s23, %s3866_s24  }
  0x2d   : > { %p3592_p10 = pnand %p3591_p11, %p3585_p8 }
  0x2f   : > { %3595 = shalt.err (!%p3592_p10)
}
  0x30   : > { %s4499_s6 = sld [smem:[#allocation26_spill]]  ;;  %s3607_s30 = scalar_lea.vmem %s3997_s20, 64 }
  0x31   : > { %p3608_p12 = scmp.ne.s32.totalorder %s3997_s20, %s3607_s30  ;;  %p3615_p2 = scmp.lt.s32.totalorder %s3997_s20, %s3997_s20 }
  0x32   : > { %p3616_p4 = scmp.lt.s32.totalorder %s3607_s30, %s3607_s30 }
  0x33   : > { %p3610_p13 = pnand %p3608_p12, %p4001_p7 }
  0x34   : > { %p3617_p5 = por %p3616_p4, %p3615_p2 }
  0x35   : > { %p3611_p0 = pneg %p3610_p13 }
  0x36   : > { %3270 = dma.hbm_to_vmem [thread:$0]  (!%p3993_p6), %s4499_s6, 16, %s391_s17, [#allocation9]  }
  0x37   : > { %p3618_p8 = pnand %p3617_p5, %p3611_p0 }
  0x39   : > { %3621 = shalt.err (!%p3618_p8)
}
  0x3a   : > { %s4500_s8 = sld [smem:[#allocation28_spill]]  ;;  %s3867_s17 = smov [#allocation14]  }
  0x3b   : > { %s438_s23 = sshll.u32 %s3867_s17, 4  ;;  %s3868_s24 = smov [#allocation7]   ;;  %s439_s23 = int_to_ptr.vmem [resolvable:$true] %s438_s23 }
  0x3c   : > { %s370_s29 = sshll.u32 %s3868_s24, 4  ;;  %s3633_s16 = scalar_lea.vmem %s439_s23, 16  ;;  %s371_s29 = int_to_ptr.vmem [resolvable:$true] %s370_s29 }
  0x3d   : > { %p3634_p9 = scmp.ne.s32.totalorder %s439_s23, %s3633_s16  ;;  %s3640_s19 = scalar_lea.vmem %s439_s23, 32 }
  0x3e   : > { %p3641_p12 = scmp.lt.s32.totalorder %s439_s23, %s439_s23  ;;  %p3642_p13 = scmp.lt.s32.totalorder %s3640_s19, %s3633_s16 }
  0x3f   : > { %p3636_p11 = pnand %p3634_p9, %p4001_p7 }
  0x40   : > { %3276 = dma.hbm_to_vmem [thread:$0]  (!%p3993_p6), %s4500_s8, 64, %s3997_s20, [#allocation12]  }
  0x41   : > { %p3637_p10 = pneg %p3636_p11  ;;  %p3643_p0 = por %p3642_p13, %p3641_p12 }
  0x43   : > { %p3644_p2 = pnand %p3643_p0, %p3637_p10 }
  0x45   : > { %3647 = shalt.err (!%p3644_p2)
}
  0x46   : > { %3282 = dma.hbm_to_vmem [thread:$0]  (!%p3993_p6), %s4477_s10, 16, %s439_s23, [#allocation15]  }
  0x47   : > { %s3659_s30 = scalar_lea.vmem %s371_s29, 1024  ;;  %p3667_p9 = scmp.lt.s32.totalorder %s371_s29, %s371_s29 }
  0x48   : > { %p3660_p4 = scmp.ne.s32.totalorder %s371_s29, %s3659_s30  ;;  %p3668_p11 = scmp.lt.s32.totalorder %s3659_s30, %s3659_s30 }
  0x4a   : > { %p3662_p5 = pnand %p3660_p4, %p4001_p7  ;;  %p3669_p1 = por %p3668_p11, %p3667_p9 }
  0x4c   : > { %p3663_p8 = pneg %p3662_p5 }
  0x4e   : > { %p3670_p3 = pnand %p3669_p1, %p3663_p8 }
  0x50   : > { %3673 = shalt.err (!%p3670_p3)
}
  0x51   : > { %s4484_s11 = smov 64   ;;  %s4485_s13 = smov 4  }
  0x52   : > { %s4501_s3 = sld [smem:[#allocation25_spill]]  ;;  %s3871_s24 = smov [#allocation10]  }
  0x53   : > { %s400_s16 = sshll.u32 %s3871_s24, 4  ;;  %s401_s16 = int_to_ptr.vmem [resolvable:$true] %s400_s16 }
  0x54   : > { %s3685_s19 = scalar_lea.vmem %s401_s16, 4096  ;;  %p3693_p12 = scmp.lt.s32.totalorder %s401_s16, %s401_s16 }
  0x55   : > { %p3686_p10 = scmp.ne.s32.totalorder %s401_s16, %s3685_s19  ;;  %p3694_p13 = scmp.lt.s32.totalorder %s3685_s19, %s3685_s19 }
  0x57   : > { %p3688_p1 = pnand %p3686_p10, %p4001_p7  ;;  %p3695_p0 = por %p3694_p13, %p3693_p12 }
  0x58   : > { %3267 = dma.hbm_to_vmem [thread:$0]  (!%p3993_p6), %s4501_s3, 1024, %s371_s29, [#allocation6], %s4484_s11, %s4484_s11, %s4485_s13  }
  0x59   : > { %p3689_p3 = pneg %p3688_p1 }
  0x5b   : > { %p3696_p2 = pnand %p3695_p0, %p3689_p3 }
  0x5d   : > { %3699 = shalt.err (!%p3696_p2)
}
  0x5e   : > { %s3872_s22 = smov 256   ;;  %s3873_s20 = smov 16  }
  0x5f   : > { %s4502_s7 = sld [smem:[#allocation27_spill]]  ;;  %s3874_s17 = smov [#allocation13]  }
  0x60   : > { %s424_s23 = sshll.u32 %s3874_s17, 4  ;;  %s3875_s24 = smov [#allocation16]   ;;  %s425_s23 = int_to_ptr.vmem [resolvable:$true] %s424_s23 }
  0x61   : > { %s452_s11 = sshll.u32 %s3875_s24, 4  ;;  %s3711_s13 = scalar_lea.vmem %s425_s23, 4096  ;;  %s453_s11 = int_to_ptr.vmem [resolvable:$true] %s452_s11 }
  0x62   : > { %p3712_p4 = scmp.ne.s32.totalorder %s425_s23, %s3711_s13  ;;  %p3719_p9 = scmp.lt.s32.totalorder %s425_s23, %s425_s23 }
  0x63   : > { %p3720_p11 = scmp.lt.s32.totalorder %s3711_s13, %s3711_s13 }
  0x64   : > { %p3714_p5 = pnand %p3712_p4, %p4001_p7 }
  0x65   : > { %3273 = dma.hbm_to_vmem [thread:$0]  (!%p3993_p6), %s4502_s7, 4096, %s401_s16, [#allocation9], %s3872_s22, %s3872_s22, %s3873_s20  }
  0x66   : > { %p3715_p8 = pneg %p3714_p5  ;;  %p3721_p10 = por %p3720_p11, %p3719_p9 }
  0x68   : > { %p3722_p1 = pnand %p3721_p10, %p3715_p8 }
  0x6a   : > { %3725 = shalt.err (!%p3722_p1)
}
  0x6b   : > { %s4503_s19 = smov 4   ;;  %s4504_s16 = smov 64  }
  0x6c   : > { %3279 = dma.hbm_to_vmem [thread:$0]  (!%p3993_p6), %s4476_s9, 4096, %s425_s23, [#allocation12], %s4504_s16, %s4504_s16, %s4503_s19  }
  0x6d   : > { %s3737_s30 = scalar_lea.vmem %s453_s11, 16  ;;  %s3744_s29 = scalar_lea.vmem %s453_s11, 32 }
  0x6e   : > { %p3738_p3 = scmp.ne.s32.totalorder %s453_s11, %s3737_s30  ;;  %p3745_p0 = scmp.lt.s32.totalorder %s453_s11, %s453_s11 }
  0x6f   : > { %p3746_p2 = scmp.lt.s32.totalorder %s3744_s29, %s3737_s30 }
  0x70   : > { %p3740_p12 = pnand %p3738_p3, %p4001_p7 }
  0x71   : > { %p3747_p4 = por %p3746_p2, %p3745_p0 }
  0x72   : > { %p3741_p13 = pneg %p3740_p12 }
  0x74   : > { %p3748_p5 = pnand %p3747_p4, %p3741_p13 }
  0x76   : > { %3751 = shalt.err (!%p3748_p5)
}
  0x77   : > { %3285 = dma.hbm_to_vmem [thread:$0]  (!%p3993_p6), %s4479_s12, 16, %s453_s11, [#allocation15]  }
  0x78   : > { %s2858_s21 = sadd.s32 4294967294, %s3860_s28   ;;  %s4074_s18 = sadd.s32 1, %s3860_s28  }
  0x79   : > { %s37_s23 = ssub.s32 %s3860_s28, %s4074_s18  ;;  %s40_s24 = sadd.s32 1, %s3856_s27 }
  0x7a   : > { %p38_p7 = scmp.eq.s32.totalorder %s37_s23, 0  ;;  %p47_p8 = scmp.ne.s32.totalorder %s3856_s27, %s3852_s26 }
  0x7b   : > { %p48_p9 = scmp.eq.s32.totalorder %s3860_s28, 0  ;;  %p53_p11 = scmp.ne.s32.totalorder %s3852_s26, %s3848_s25 }
  0x7c   : > { %s4085_s19 = scalar_select %p38_p7, %s3856_s27, %s40_s24  }
  0x7d   : > { %p4087_p10 = por %p48_p9, %p47_p8  ;;  %p4506_p1 = scmp.eq.s32.totalorder %s3979_s14, 0 }
  0x7e   : > { %p329_p3 = scmp.eq.s32.totalorder %s3979_s14, 1  ;;  %p335_p12 = scmp.eq.s32.totalorder %s2858_s21, 1 }
  0x7f   : > { %p4093_p6 = por %p4506_p1, %p53_p11  ;;  %p3302_p13 = scmp.lt.s32.totalorder %s3860_s28, 2 }
  0x80   : > { %s463_s22 = sand.u32 1, %s3856_s27   ;;  %p4100_p0 = por %p329_p3, %p47_p8 }
  0x81   : > { %s4507_s11 = scalar_select %p4093_p6, 1, 0 }
  0x82   : > { %s4508_s20 = scalar_select %p4100_p0, 1, 0 }
  0x83   : > { %p4104_p2 = por %p335_p12, %p53_p11  ;;  %s2869_s29 = sshll.u32 %s463_s22, 4 }
  0x84   : > { %s3018_s13 = sshll.u32 %s3860_s28, 8  ;;  %s467_s21 = scalar_lea.vmem [#allocation2], %s2869_s29 }
  0x85   : > { %s4509_s30 = scalar_select %p4104_p2, 1, 0 }
  0x86   : > { %s4112_s24 = scalar_lea.hbm %s4467_s0, %s3018_s13  ;;  %s474_s1 = sshll.u32 %s467_s21, 4  ;;  %s4114_s1 = int_to_ptr.vmem [resolvable:$true] %s474_s1 }
  0x87   : > { %p4118_p4 = pnand %p3302_p13, %p4087_p10  ;;  %s4122_s6 = scalar_lea.sflag [#allocation3], %s463_s22 }
  0x88   : > { %s3752_s7 = scalar_lea.hbm %s4112_s24, 256  ;;  %s3757_s29 = scalar_lea.hbm %s4467_s0, 512 }
  0x89   : > { %p3753_p5 = scmp.ne.s32.totalorder %s4112_s24, %s3752_s7  ;;  %p3754_p7 = pneg %p4118_p4 }
  0x8a   : > { %p3758_p11 = scmp.lt.s32.totalorder %s4112_s24, %s4467_s0  ;;  %p3759_p10 = scmp.lt.s32.totalorder %s3757_s29, %s3752_s7 }
  0x8b   : > { %p3755_p8 = pnand %p3754_p7, %p3753_p5 }
  0x8c   : > { %p3760_p1 = por %p3759_p10, %p3758_p11 }
  0x8d   : > { %p3756_p9 = pneg %p3755_p8 }
  0x8f   : > { %p3761_p3 = pnand %p3760_p1, %p3756_p9 }
  0x91   : > { %3764 = shalt.err (!%p3761_p3)
}
  0x92   : > { %s3765_s16 = scalar_lea.vmem %s4114_s1, 256  ;;  %s3876_s22 = smov [#allocation2]  }
  0x93   : > { %p3766_p12 = scmp.ne.s32.totalorder %s4114_s1, %s3765_s16  ;;  %s3770_s8 = sshll.u32 %s3876_s22, 4  ;;  %s3771_s8 = int_to_ptr.vmem [resolvable:$false] %s3770_s8 }
  0x94   : > { %s3772_s13 = scalar_lea.vmem %s3771_s8, 512  ;;  %p3773_p8 = scmp.lt.s32.totalorder %s4114_s1, %s3771_s8 }
  0x95   : > { %p3768_p13 = pnand %p3766_p12, %p3754_p7  ;;  %p3774_p2 = scmp.lt.s32.totalorder %s3772_s13, %s3765_s16 }
  0x97   : > { %p3769_p5 = pneg %p3768_p13  ;;  %p3775_p0 = por %p3774_p2, %p3773_p8 }
  0x99   : > { %p3776_p6 = pnand %p3775_p0, %p3769_p5 }
  0x9b   : > { %3779 = shalt.err (!%p3776_p6)
}
  0x9c   : > { %s3877_s7 = smov 128   ;;  %s3878_s17 = smov 8  }
  0x9d   : > { %3289 = dma.hbm_to_vmem [thread:$0]  (!%p4118_p4), %s4112_s24, 256, %s4114_s1, %s4122_s6, %s3877_s7, %s3877_s7, %s3878_s17  }
  0x9e   : > { %p4511_p7 = scmp.ne.s32.totalorder %s4495_s15, 0 }
  0x9f   : > { %s4146_s29 = sand.u32 (!%p4511_p7), 1, %s3852_s26   ;;  %p4512_p6 = scmp.ne.s32.totalorder (!%p4511_p7), %s4507_s11, 0 }
  0xa0   : > { %486 = sbr.rel (%p4511_p7) target bundleno = 3747 (0xea3), region = 72  ;;  %s2873_s8 = sshll.u32 (!%p4511_p7), %s4146_s29, 4 }
  0xa1   : > { %s489_s23 = scalar_lea.sflag (!%p4511_p7), [#allocation3], %s4146_s29  ;;  %s4152_s21 = scalar_lea.vmem (!%p4511_p7), [#allocation2], %s2873_s8 }
  0xa5   : > { %3823 = dma.done.wait (%p4512_p6), %s489_s23, 256  }
  0xa6   : > { %3825 = vsyncadd (%p4512_p6), %s489_s23, 4294967040  ;;  %p4513_p0 = scmp.eq.s32.totalorder %s3979_s14, 0 }
  0xa8   : > { %3827 = dma.done.wait (%p4513_p0), [#allocation6], 4096   ;;  %p4514_p2 = pmov %p4513_p0 }
  0xa9   : > { %p4515_p4 = pmov %p4513_p0 }
  0xaa   : > { %3829 = vsyncadd (%p4514_p2), [#allocation6], 4294963200 }
  0xab   : > { %3831 = dma.done.wait (%p4515_p4), [#allocation9], 4112   ;;  %p4516_p9 = pmov %p4513_p0 }
  0xac   : > { %p4517_p11 = pmov %p4513_p0 }
  0xad   : > { %3833 = vsyncadd (%p4516_p9), [#allocation9], 4294963184 }
  0xae   : > { %3835 = dma.done.wait (%p4517_p11), [#allocation12], 4160   ;;  %p4518_p10 = pmov %p4513_p0 }
  0xaf   : > { %p4519_p1 = pmov %p4513_p0 }
  0xb0   : > { %3837 = vsyncadd (%p4518_p10), [#allocation12], 4294963136 }
  0xb1   : > { %3839 = dma.done.wait (%p4519_p1), [#allocation15], 32   ;;  %p4520_p3 = pmov %p4513_p0 }
  0xb2   : > { %v3879_v0 = vmov 0   ;;  %v3368_v1 = vld [vmem:[#allocation5 + $0xac] ss:$12 sps:$4 sm:$0xff]   ;;  %v3370_v2 = vld [vmem:[#allocation5 + $0xa8] ss:$12 sps:$4 sm:$0xff]   ;;  %v605_v20 = vlaneseq  ;;  %vm832_vm0 = vcmask 261120  }
  0xb3   : > { %3841 = vsyncadd (%p4520_p3), [#allocation15], 4294967264  ;;  %780 = vmatprep.mubr.bf16.mxu0 %v3879_v0  ;;  %748 = vmatprep.subr.bf16.mxu0 %v3368_v1  ;;  %v3371_v3 = vld [vmem:[#allocation5 + $0x94] ss:$12 sps:$4 sm:$0xff]   ;;  %v3373_v4 = vld [vmem:[#allocation5 + $0x90] ss:$12 sps:$4 sm:$0xff]  }
  0xb4   : > { %749 = vmatpush1.bf16.msra.mxu0 %v3370_v2  ;;  %v3374_v5 = vld [vmem:[#allocation5 + $0x7c] ss:$12 sps:$4 sm:$0xff]   ;;  %v3376_v6 = vld [vmem:[#allocation5 + $0x78] ss:$12 sps:$4 sm:$0xff]   ;;  %v3379_v8 = vld [vmem:[#allocation5 + $0x60] ss:$12 sps:$4 sm:$0xff]  }
  0xb5   : > { %750 = vmatprep.subr.bf16.mxu0 %v3371_v3  ;;  %v3377_v7 = vld [vmem:[#allocation5 + $0x64] ss:$12 sps:$4 sm:$0xff]   ;;  %v3380_v9 = vld [vmem:[#allocation5 + $0x4c] ss:$12 sps:$4 sm:$0xff]   ;;  %v3382_v10 = vld [vmem:[#allocation5 + $0x48] ss:$12 sps:$4 sm:$0xff]  }
  0xb6   : > { %v3383_v11 = vld [vmem:[#allocation5 + $0x34] ss:$12 sps:$4 sm:$0xff]   ;;  %v3385_v12 = vld [vmem:[#allocation5 + $0x30] ss:$12 sps:$4 sm:$0xff]   ;;  %v3388_v14 = vld [vmem:[#allocation5 + $0x18] ss:$12 sps:$4 sm:$0xff]  }
  0xb7   : > { %v3386_v13 = vld [vmem:[#allocation5 + $0x1c] ss:$12 sps:$4 sm:$0xff]   ;;  %v3389_v15 = vld [vmem:[#allocation5 + $0x4] ss:$12 sps:$4 sm:$0xff]   ;;  %v3391_v16 = vld [vmem:[#allocation5] ss:$12 sps:$4 sm:$0xff]  }
  0xb8   : > { %751 = vmatpush1.bf16.msra.mxu0 %v3373_v4  ;;  %v4176_v17 = vld [vmem:[%s4152_s21] sm:$0xff]  ;;  %v4179_v18 = vld [vmem:[%s4152_s21 + $0x8] sm:$0xff]  ;;  %v4183_v21 = vshrl.u32 %v605_v20, 7  ;;  %s3880_s6 = smov 96   ;;  %v3881_v36 = vmov 0.0   ;;  %vm3882_vm1 = vmmov 0  }
  0xb9   : > { %752 = vmatprep.subr.bf16.mxu0 %v3374_v5  ;;  %v570_v19 = vpack.c.bf16 %v4179_v18, %v4176_v17  ;;  %v4189_v23 = vld [vmem:[%s4469_s2] sm:$0x7]  ;;  %v3392_v35 = vld [vmem:[#allocation5 + $0xb0] ss:$12 sps:$4 sm:$0xff]   ;;  %3117 = vmatprep.subr.bf16.mxu1 %v3881_v36  ;;  %v3393_v37 = vld [vmem:[#allocation5 + $0x98] ss:$12 sps:$4 sm:$0xff]  }
  0xba   : > { %v607_v22 = vsub.s32 0, %v4183_v21  ;;  %v611_v27 = vsub.s32 1, %v4183_v21  ;;  %3133 = vmatprep.mubr.msk.bf16.mxu1 %vm3882_vm1, %v3881_v36  ;;  %3118 = vmatpush3.bf16.msra.mxu1 %v3392_v35  ;;  %v3394_v38 = vld [vmem:[#allocation5 + $0x80] ss:$12 sps:$4 sm:$0xff]   ;;  %v3395_v39 = vld [vmem:[#allocation5 + $0x68] ss:$12 sps:$4 sm:$0xff]  }
  0xbb   : > { %3119 = vmatprep.subr.bf16.mxu1 %v3881_v36  ;;  %v3396_v40 = vld [vmem:[#allocation5 + $0x50] ss:$12 sps:$4 sm:$0xff]   ;;  %v3397_v41 = vld [vmem:[#allocation5 + $0x38] ss:$12 sps:$4 sm:$0xff]   ;;  %v3398_v42 = vld [vmem:[#allocation5 + $0x20] ss:$12 sps:$4 sm:$0xff]  }
  0xbc   : > { %753 = vmatpush1.bf16.msra.mxu0 %v3376_v6  ;;  %v608_v24 = vrot.slane %v4189_v23, %v607_v22  ;;  %v612_v30 = vrot.slane %v4189_v23, %v611_v27  ;;  %v3399_v43 = vld [vmem:[#allocation5 + $0x8] ss:$12 sps:$4 sm:$0xff]   ;;  %vm920_vm2 = vcmask 130048   ;;  %v615_v62 = vsub.s32 2, %v4183_v21  ;;  %s3883_s15 = smov 64   ;;  %s3884_s11 = smov 32  }
  0xbd   : > { %754 = vmatprep.subr.bf16.mxu0 %v3377_v7  ;;  %s4521_s23 = sld [smem:[#allocation29_spill]]  ;;  %s3019_s21 = sshll.u32 %s3979_s14, 8 }
  0xbe   : > { %3120 = vmatpush3.bf16.msra.mxu1 %v3393_v37  ;;  %v616_v1 = vrot.slane %v4189_v23, %v615_v62  ;;  %s566_s1 = scalar_lea.vmem [#allocation17], %s2873_s8  ;;  %s2696_s16 = scalar_lea.sflag [#allocation4], %s4146_s29 }
  0xbf   : > { %3121 = vmatprep.subr.bf16.mxu1 %v3881_v36  ;;  %s2709_s3 = sshll.u32 %s566_s1, 4  ;;  %p4523_p13 = scmp.ne.s32.totalorder %s4508_s20, 0  ;;  %s4424_s3 = int_to_ptr.vmem [resolvable:$true] %s2709_s3 }
  0xc0   : > { %755 = vmatpush1.bf16.msra.mxu0 %v3379_v8  ;;  %s3780_s22 = scalar_lea.vmem %s4424_s3, 256  ;;  %s3885_s14 = smov [#allocation17]  }
  0xc1   : > { %756 = vmatprep.subr.bf16.mxu0 %v3380_v9  ;;  %p3781_p12 = scmp.ne.s32.totalorder %s4424_s3, %s3780_s22  ;;  %s3784_s8 = sshll.u32 %s3885_s14, 4  ;;  %s3785_s8 = int_to_ptr.vmem [resolvable:$false] %s3784_s8 }
  0xc2   : > { %3122 = vmatpush3.bf16.msra.mxu1 %v3394_v38  ;;  %v3403_v38 = vld [vmem:[#allocation7] sm:$0xff]   ;;  %s3786_s13 = scalar_lea.vmem %s3785_s8, 512  ;;  %p3787_p7 = scmp.lt.s32.totalorder %s4424_s3, %s3785_s8 }
  0xc3   : > { %3123 = vmatprep.subr.bf16.mxu1 %v3881_v36  ;;  %p3782_p5 = pnand %p3781_p12, %p4523_p13  ;;  %p3788_p6 = scmp.lt.s32.totalorder %s3786_s13, %s3780_s22 }
  0xc4   : > { %757 = vmatpush1.bf16.msra.mxu0 %v3382_v10 }
  0xc5   : > { %758 = vmatprep.subr.bf16.mxu0 %v3383_v11  ;;  %p3783_p8 = pneg %p3782_p5  ;;  %p3789_p0 = por %p3788_p6, %p3787_p7 }
  0xc6   : > { %3124 = vmatpush3.bf16.msra.mxu1 %v3395_v39 }
  0xc7   : > { %3125 = vmatprep.subr.bf16.mxu1 %v3881_v36  ;;  %p3790_p2 = pnand %p3789_p0, %p3783_p8 }
  0xc8   : > { %759 = vmatpush1.bf16.msra.mxu0 %v3385_v12 }
  0xc9   : > { %760 = vmatprep.subr.bf16.mxu0 %v3386_v13 }
  0xca   : > { %3126 = vmatpush3.bf16.msra.mxu1 %v3396_v40 }
  0xcb   : > { %3127 = vmatprep.subr.bf16.mxu1 %v3881_v36 }
  0xcc   : > { %761 = vmatpush1.bf16.msra.mxu0 %v3388_v14 }
  0xcd   : > { %762 = vmatprep.subr.bf16.mxu0 %v3389_v15 }
  0xce   : > { %3128 = vmatpush3.bf16.msra.mxu1 %v3397_v41 }
  0xcf   : > { %3129 = vmatprep.subr.bf16.mxu1 %v3881_v36 }
  0xd0   : > { %763 = vmatpush1.bf16.msra.mxu0 %v3391_v16 }
  0xd2   : > { %3130 = vmatpush3.bf16.msra.mxu1 %v3398_v42 }
  0xd3   : > { %781 = vmatmul.mubr.bf16.vlgmr.msra.gmra.mxu0 %v570_v19  ;;  %3131 = vmatprep.subr.bf16.mxu1 %v3881_v36 }
  0xd6   : > { %3132 = vmatpush3.bf16.msra.mxu1 %v3399_v43 }
  0xd9   : > { %3134 = vmatmul.mubr.bf16.vlgmr.msra.gmra.mxu1 %v570_v19 }
 0x193   : > { %v782_v25 = vpop.f32.mrf.mxu0 }
 0x194   : > { %v4194_v26 = vadd.f32 %v782_v25, %v608_v24 }
 0x195   : > { %v784_v28 = vpop.f32.mrf.mxu0 }
 0x196   : > { %1029 = vrot.lane.b32.xlu1 %v4194_v26, %s3880_s6  ;;  %3141 = vmatprep.mubr.msk.f32.mxu0 %vm832_vm0, %v4194_v26  ;;  %v4210_v34 = vadd.f32 %v784_v28, %v612_v30 }
 0x197   : > { %v786_v29 = vpop.f32.mrf.mxu0 }
 0x198   : > { %v4204_v31 = vadd.f32 %v786_v29, %v608_v24 }
 0x199   : > { %v788_v32 = vpop.f32.mrf.mxu0  ;;  %v825_v63 = vpop.f32.mrf.mxu1 }
 0x19a   : > { %v4206_v33 = vadd.f32 %v788_v32, %v612_v30  ;;  %1031 = vrot.lane.b32.xlu1 %v4204_v31, %s3880_s6  ;;  %v4256_v9 = vadd.f32 %v825_v63, %v616_v1  ;;  %v3402_v32 = vld [vmem:[#allocation7 + $0x8] sm:$0xff]  }
 0x19b   : > { %v3135_v2 = vpop.f32.mrf.mxu1 }
 0x19c   : > { %1035 = vrot.lane.b32.xlu0 %v4206_v33, %s3880_s6  ;;  %3137 = vmatprep.subr.msk.mxu0 %vm832_vm0, %v4206_v33 }
 0x19d   : > { %3138 = vmatpush3.xpose.msk.msra.mxu0 %vm832_vm0, %v4206_v33  ;;  %v828_v3 = vpop.f32.mrf.mxu1 }
 0x19e   : > { %3139 = vmatprep.subr.msk.mxu0 %vm832_vm0, %v4210_v34  ;;  %v4253_v5 = vadd.f32 %v828_v3, %v616_v1 }
 0x19f   : > { %v3136_v7 = vpop.f32.mrf.mxu1 }
 0x1a0   : > { %1033 = vrot.lane.b32.xlu0 %v4210_v34, %s3880_s6  ;;  %3144 = vmatprep.subr.mxu1 %v4253_v5 }
 0x1a1   : > { %3140 = vmatpush3.xpose.msk.msra.mxu0 %vm832_vm0, %v4210_v34  ;;  %3145 = vmatpush3.msra.mxu1 %v4253_v5 }
 0x1a2   : > { %3146 = vmatprep.subr.mxu1 %v4256_v9 }
 0x1a3   : > { %3147 = vmatpush3.msra.mxu1 %v4256_v9 }
 0x1a4   : > { %3142 = vmatmul.mubr.msk.f32.vlgmr.msra.gmra.mxu0 %vm832_vm0, %v4204_v31 }
 0x208   : > { %v1030_v44 = vpop.permute.xlu1 %1029 }
 0x209   : > { %3155 = vmatprep.mubr.msk.f32.mxu0 %vm832_vm0, %v1030_v44 }
 0x20c   : > { %v1032_v47 = vpop.permute.xlu1 %1031 }
 0x20e   : > { %v1036_v45 = vpop.permute.xlu0 %1035 }
 0x20f   : > { %3151 = vmatprep.subr.msk.mxu0 %vm832_vm0, %v1036_v45 }
 0x210   : > { %3152 = vmatpush3.xpose.msk.msra.mxu0 %vm832_vm0, %v1036_v45 }
 0x212   : > { %v1034_v46 = vpop.permute.xlu0 %1033 }
 0x213   : > { %3153 = vmatprep.subr.msk.mxu0 %vm832_vm0, %v1034_v46 }
 0x214   : > { %3154 = vmatpush3.xpose.msk.msra.mxu0 %vm832_vm0, %v1034_v46  ;;  %v3400_v46 = vld [vmem:[#allocation7 + $0x18] sm:$0xff]  }
 0x215   : > { %3173 = vmatprep.subr.bf16.mxu0 %v3881_v36 }
 0x217   : > { %3156 = vmatmul.mubr.msk.f32.vlgmr.msra.gmra.mxu0 %vm832_vm0, %v1032_v47 }
 0x218   : > { %3177 = vmatprep.mubr.msk.bf16.mxu0 %vm3882_vm1, %v3881_v36  ;;  %3174 = vmatpush3.bf16.msra.mxu0 %v3402_v32 }
 0x219   : > { %3175 = vmatprep.subr.bf16.mxu0 %v3881_v36 }
 0x21c   : > { %3176 = vmatpush3.bf16.msra.mxu0 %v3403_v38 }
 0x264   : > { %v3143_v48 = vpop.f32.mrf.mxu0 }
 0x265   : > { %v924_v49 = vsel %vm920_vm2, %v3143_v48, -inf }
 0x266   : > { %925 = vmax.xlane.f32.xlu1 %v924_v49  ;;  %v911_v50 = vpop.f32.mrf.mxu0 }
 0x267   : > { %v921_v51 = vsel %vm920_vm2, %v911_v50, -inf }
 0x268   : > { %922 = vmax.xlane.f32.xlu0 %v921_v51 }
 0x2d7   : > { %v3157_v52 = vpop.f32.mrf.mxu0 }
 0x2d8   : > { %v1123_v55 = vsel %vm920_vm2, %v3157_v52, -inf }
 0x2d9   : > { %v1111_v53 = vpop.f32.mrf.mxu0 }
 0x2da   : > { %v1120_v54 = vsel %vm920_vm2, %v1111_v53, -inf }
 0x2db   : > { %1121 = vmax.xlane.f32.xlu0 %v1120_v54 }
 0x2df   : > { %1124 = vmax.xlane.f32.xlu0 %v1123_v55 }
 0x2ef   : > { %v926_v56 = vpop.xlane.xlu1 %925 }
 0x2f0   : > { %v928_v57 = vsub.f32 %v3143_v48, %v926_v56  ;;  %v3401_v48 = vld [vmem:[#allocation7 + $0x10] sm:$0xff]  }
 0x2f1   : > { %v923_v58 = vpop.xlane.xlu0 %922 }
 0x2f2   : > { %v931_v59 = vmul.f32 1.442695, %v928_v57  ;;  %v927_v60 = vsub.f32 %v911_v50, %v923_v58 }
 0x2f4   : > { %3488 = vpow2.f32 %v931_v59  ;;  %v929_v61 = vmul.f32 1.442695, %v927_v60 }
 0x2f6   : > { %3490 = vpow2.f32 %v929_v61 }
 0x301   : > { %v3489_v4 = vpop.eup %3488 }
 0x302   : > { %v936_v6 = vsel %vm920_vm2, %v3489_v4, 0.0 }
 0x303   : > { %v3491_v8 = vpop.eup %3490  ;;  %937 = vadd.xlane.f32.xlu0 %v936_v6 }
 0x304   : > { %v933_v10 = vsel %vm920_vm2, %v3491_v8, 0.0 }
 0x305   : > { %934 = vadd.xlane.f32.xlu1 %v933_v10 }
 0x364   : > { %v1122_v11 = vpop.xlane.xlu0 %1121 }
 0x365   : > { %v1126_v12 = vsub.f32 %v1111_v53, %v1122_v11 }
 0x367   : > { %v1128_v13 = vmul.f32 1.442695, %v1126_v12 }
 0x368   : > { %v1125_v14 = vpop.xlane.xlu0 %1124 }
 0x369   : > { %3492 = vpow2.f32 %v1128_v13  ;;  %v1127_v15 = vsub.f32 %v3157_v52, %v1125_v14 }
 0x36b   : > { %v1130_v16 = vmul.f32 1.442695, %v1127_v15 }
 0x36d   : > { %3494 = vpow2.f32 %v1130_v16 }
 0x376   : > { %v3493_v19 = vpop.eup %3492 }
 0x377   : > { %v1132_v20 = vsel %vm920_vm2, %v3493_v19, 0.0 }
 0x378   : > { %1133 = vadd.xlane.f32.xlu1 %v1132_v20 }
 0x37a   : > { %v3495_v23 = vpop.eup %3494 }
 0x37b   : > { %v1135_v24 = vsel %vm920_vm2, %v3495_v23, 0.0 }
 0x37c   : > { %1136 = vadd.xlane.f32.xlu0 %v1135_v24 }
 0x389   : > { %1146 = vrot.lane.b32.xlu1 %v4253_v5, %s3880_s6 }
 0x38c   : > { %v938_v25 = vpop.xlane.xlu0 %937 }
 0x38d   : > { %1355 = vrot.lane.b32.xlu1 %v4206_v33, %s3883_s15  ;;  %3496 = vrcp.f32 %v938_v25 }
 0x38e   : > { %v935_v28 = vpop.xlane.xlu1 %934 }
 0x38f   : > { %3498 = vrcp.f32 %v935_v28 }
 0x391   : > { %1353 = vrot.lane.b32.xlu1 %v4210_v34, %s3883_s15 }
 0x392   : > { %1144 = vrot.lane.b32.xlu0 %v4256_v9, %s3880_s6 }
 0x395   : > { %1351 = vrot.lane.b32.xlu1 %v4204_v31, %s3883_s15 }
 0x396   : > { %1349 = vrot.lane.b32.xlu0 %v4194_v26, %s3883_s15 }
 0x39a   : > { %v3497_v29 = vpop.eup %3496 }
 0x39b   : > { %v942_v37 = vmul.f32 %v3497_v29, %v3489_v4 }
 0x39c   : > { %v3499_v30 = vpop.eup %3498 }
 0x39d   : > { %v941_v35 = vmul.f32 %v3499_v30, %v3491_v8 }
 0x39f   : > { %3148 = vmatprep.mubr.msk.f32.mxu1 %vm920_vm2, %v941_v35 }
 0x3a0   : > { %3149 = vmatmul.mubr.msk.f32.vlgmr.msra.gmra.mxu1 %vm920_vm2, %v942_v37 }
 0x401   : > { %v1134_v39 = vpop.xlane.xlu1 %1133 }
 0x402   : > { %3500 = vrcp.f32 %v1134_v39 }
 0x405   : > { %v1147_v40 = vpop.permute.xlu1 %1146  ;;  %v1137_v41 = vpop.xlane.xlu0 %1136 }
 0x406   : > { %3502 = vrcp.f32 %v1137_v41  ;;  %3158 = vmatprep.subr.mxu1 %v1147_v40 }
 0x407   : > { %3159 = vmatpush3.msra.mxu1 %v1147_v40  ;;  %v3405_v40 = vld [vmem:[#allocation7 + $0x20] sm:$0xff]  }
 0x409   : > { %v1145_v42 = vpop.permute.xlu0 %1144  ;;  %v1356_v49 = vpop.permute.xlu1 %1355 }
 0x40a   : > { %3160 = vmatprep.subr.mxu1 %v1145_v42 }
 0x40b   : > { %3161 = vmatpush3.msra.mxu1 %v1145_v42 }
 0x40c   : > { %3165 = vmatprep.subr.bf16.mxu1 %v3881_v36 }
 0x40d   : > { %v1350_v56 = vpop.permute.xlu0 %1349  ;;  %v1354_v57 = vpop.permute.xlu1 %1353 }
 0x40f   : > { %v3501_v43 = vpop.eup %3500 }
 0x410   : > { %v1140_v44 = vmul.f32 %v3501_v43, %v3493_v19 }
 0x411   : > { %v1352_v58 = vpop.permute.xlu1 %1351 }
 0x412   : > { %3162 = vmatprep.mubr.msk.f32.mxu1 %vm920_vm2, %v1140_v44 }
 0x413   : > { %v3503_v45 = vpop.eup %3502 }
 0x414   : > { %v1141_v47 = vmul.f32 %v3503_v45, %v3495_v23 }
 0x416   : > { %3163 = vmatmul.mubr.msk.f32.vlgmr.msra.gmra.mxu1 %vm920_vm2, %v1141_v47 }
 0x417   : > { %3166 = vmatpush3.bf16.msra.mxu1 %v3400_v46  ;;  %3169 = vmatprep.mubr.msk.bf16.mxu1 %vm3882_vm1, %v3881_v36 }
 0x418   : > { %3167 = vmatprep.subr.bf16.mxu1 %v3881_v36 }
 0x41b   : > { %3168 = vmatpush3.bf16.msra.mxu1 %v3401_v48 }
 0x41c   : > { %3181 = vmatprep.subr.msk.mxu1 %vm832_vm0, %v1356_v49 }
 0x460   : > { %v3150_v50 = vpop.f32.mrf.mxu1 }
 0x462   : > { %v1015_v51 = vpop.f32.mrf.mxu1 }
 0x463   : > { %v1024_v52 = vpack.c.bf16 %v3150_v50, %v1015_v51 }
 0x465   : > { %3178 = vmatmul.mubr.msk.bf16.vlgmr.msra.gmra.mxu0 %vm832_vm0, %v1024_v52 }
 0x4d6   : > { %v3164_v53 = vpop.f32.mrf.mxu1 }
 0x4d8   : > { %v1222_v54 = vpop.f32.mrf.mxu1 }
 0x4d9   : > { %v1231_v55 = vpack.c.bf16 %v3164_v53, %v1222_v54 }
 0x4db   : > { %3170 = vmatmul.mubr.msk.bf16.vlgmr.msra.gmra.mxu1 %vm832_vm0, %v1231_v55 }
 0x4dc   : > { %3182 = vmatpush3.xpose.msk.msra.mxu1 %vm832_vm0, %v1356_v49  ;;  %3185 = vmatprep.mubr.msk.f32.mxu1 %vm832_vm0, %v1350_v56 }
 0x4dd   : > { %3183 = vmatprep.subr.msk.mxu1 %vm832_vm0, %v1354_v57 }
 0x4e0   : > { %3184 = vmatpush3.xpose.msk.msra.mxu1 %vm832_vm0, %v1354_v57 }
 0x4e1   : > { %3195 = vmatprep.subr.bf16.mxu1 %v3881_v36 }
 0x4e3   : > { %3186 = vmatmul.mubr.msk.f32.vlgmr.msra.gmra.mxu1 %vm832_vm0, %v1352_v58 }
 0x4e4   : > { %3199 = vmatprep.mubr.msk.bf16.mxu1 %vm3882_vm1, %v3881_v36 }
 0x525   : > { %v4297_v59 = vpop.f32.mrf.mxu0 }
 0x527   : > { %v3179_v60 = vpop.f32.mrf.mxu0 }
 0x529   : > { %v4299_v61 = vpop.f32.mrf.mxu0 }
 0x52b   : > { %v3180_v63 = vpop.f32.mrf.mxu0 }
 0x59b   : > { %v4301_v1 = vpop.f32.mrf.mxu1 }
 0x59d   : > { %v3171_v2 = vpop.f32.mrf.mxu1 }
 0x59e   : > { %v3406_v2 = vld [vmem:[#allocation7 + $0x38] sm:$0xff]  }
 0x59f   : > { %v4303_v3 = vpop.f32.mrf.mxu1 }
 0x5a1   : > { %v3172_v4 = vpop.f32.mrf.mxu1 }
 0x5a3   : > { %v3187_v6 = vpop.f32.mrf.mxu1 }
 0x5a4   : > { %v1443_v7 = vsel %vm920_vm2, %v3187_v6, -inf }
 0x5a5   : > { %1444 = vmax.xlane.f32.xlu1 %v1443_v7  ;;  %v1431_v8 = vpop.f32.mrf.mxu1 }
 0x5a6   : > { %v1440_v10 = vsel %vm920_vm2, %v1431_v8, -inf }
 0x5a7   : > { %1441 = vmax.xlane.f32.xlu0 %v1440_v10 }
 0x5b6   : > { %1464 = vrot.lane.b32.xlu1 %v4253_v5, %s3883_s15 }
 0x5ba   : > { %1619 = vrot.lane.b32.xlu1 %v4206_v33, %s3884_s11 }
 0x5be   : > { %1617 = vrot.lane.b32.xlu1 %v4210_v34, %s3884_s11 }
 0x5c2   : > { %1615 = vrot.lane.b32.xlu1 %v4204_v31, %s3884_s11  ;;  %v3404_v31 = vld [vmem:[#allocation7 + $0x28] sm:$0xff]  }
 0x5c3   : > { %3196 = vmatpush3.bf16.msra.mxu1 %v3404_v31 }
 0x5c4   : > { %3197 = vmatprep.subr.bf16.mxu1 %v3881_v36 }
 0x5c7   : > { %3198 = vmatpush3.bf16.msra.mxu1 %v3405_v40 }
 0x5c8   : > { %3217 = vmatprep.subr.bf16.mxu1 %v3881_v36 }
 0x62e   : > { %v1445_v11 = vpop.xlane.xlu1 %1444 }
 0x62f   : > { %v1447_v12 = vsub.f32 %v3187_v6, %v1445_v11  ;;  %v1346_v6 = vadd.f32 %v4299_v61, %v4303_v3 }
 0x630   : > { %v1442_v13 = vpop.xlane.xlu0 %1441 }
 0x631   : > { %v1450_v14 = vmul.f32 1.442695, %v1447_v12  ;;  %v1446_v15 = vsub.f32 %v1431_v8, %v1442_v13 }
 0x632   : > { %v1465_v16 = vpop.permute.xlu1 %1464 }
 0x633   : > { %3504 = vpow2.f32 %v1450_v14  ;;  %v1448_v19 = vmul.f32 1.442695, %v1446_v15  ;;  %3188 = vmatprep.subr.mxu0 %v1465_v16 }
 0x634   : > { %3189 = vmatpush3.msra.mxu0 %v1465_v16 }
 0x635   : > { %3506 = vpow2.f32 %v1448_v19  ;;  %v2943_v19 = vld [vmem:[%s4471_s4] ss:$0 sm:$0xff] }
 0x636   : > { %v1620_v29 = vpop.permute.xlu1 %1619 }
 0x63a   : > { %v1618_v38 = vpop.permute.xlu1 %1617 }
 0x63e   : > { %v1616_v39 = vpop.permute.xlu1 %1615 }
 0x640   : > { %v3505_v20 = vpop.eup %3504 }
 0x641   : > { %v1455_v33 = vsel %vm920_vm2, %v3505_v20, 0.0 }
 0x642   : > { %v3507_v23 = vpop.eup %3506  ;;  %1456 = vadd.xlane.f32.xlu0 %v1455_v33 }
 0x643   : > { %v1452_v34 = vsel %vm920_vm2, %v3507_v23, 0.0 }
 0x646   : > { %1453 = vadd.xlane.f32.xlu0 %v1452_v34 }
 0x65c   : > { %1462 = vrot.lane.b32.xlu0 %v4256_v9, %s3883_s15 }
 0x660   : > { %1613 = vrot.lane.b32.xlu0 %v4194_v26, %s3884_s11 }
 0x6cb   : > { %v1457_v24 = vpop.xlane.xlu0 %1456 }
 0x6cc   : > { %3508 = vrcp.f32 %v1457_v24 }
 0x6cf   : > { %v1454_v25 = vpop.xlane.xlu0 %1453 }
 0x6d0   : > { %3510 = vrcp.f32 %v1454_v25 }
 0x6d3   : > { %v1463_v28 = vpop.permute.xlu0 %1462 }
 0x6d4   : > { %3190 = vmatprep.subr.mxu0 %v1463_v28 }
 0x6d5   : > { %3191 = vmatpush3.msra.mxu0 %v1463_v28 }
 0x6d6   : > { %3203 = vmatprep.subr.msk.mxu0 %vm832_vm0, %v1620_v29 }
 0x6d7   : > { %v1614_v26 = vpop.permute.xlu0 %1613 }
 0x6d9   : > { %v3509_v30 = vpop.eup %3508 }
 0x6da   : > { %v1461_v37 = vmul.f32 %v3509_v30, %v3505_v20  ;;  %v3408_v30 = vld [vmem:[#allocation10 + $0xe0] ss:$16 sps:$4 sm:$0xff]  }
 0x6dd   : > { %v3511_v32 = vpop.eup %3510 }
 0x6de   : > { %v1460_v35 = vmul.f32 %v3511_v32, %v3507_v23  ;;  %v3411_v32 = vld [vmem:[#allocation10 + $0xe8] ss:$16 sps:$4 sm:$0xff]  }
 0x6e0   : > { %3192 = vmatprep.mubr.msk.f32.mxu0 %vm920_vm2, %v1460_v35  ;;  %v3413_v35 = vld [vmem:[#allocation10 + $0xec] ss:$16 sps:$4 sm:$0xff]  }
 0x6e1   : > { %3193 = vmatmul.mubr.msk.f32.vlgmr.msra.gmra.mxu0 %vm920_vm2, %v1461_v37 }
 0x6e2   : > { %3204 = vmatpush3.xpose.msk.msra.mxu0 %vm832_vm0, %v1620_v29  ;;  %3207 = vmatprep.mubr.msk.f32.mxu0 %vm832_vm0, %v1614_v26 }
 0x6e3   : > { %3205 = vmatprep.subr.msk.mxu0 %vm832_vm0, %v1618_v38 }
 0x6e6   : > { %3206 = vmatpush3.xpose.msk.msra.mxu0 %vm832_vm0, %v1618_v38 }
 0x6e9   : > { %3208 = vmatmul.mubr.msk.f32.vlgmr.msra.gmra.mxu0 %vm832_vm0, %v1616_v39 }
 0x7a1   : > { %v3194_v41 = vpop.f32.mrf.mxu0 }
 0x7a3   : > { %v1540_v42 = vpop.f32.mrf.mxu0 }
 0x7a4   : > { %v1549_v43 = vpack.c.bf16 %v3194_v41, %v1540_v42  ;;  %v3416_v42 = vld [vmem:[#allocation10 + $0xc4] ss:$16 sps:$4 sm:$0xff]  }
 0x7a6   : > { %3200 = vmatmul.mubr.msk.bf16.vlgmr.msra.gmra.mxu1 %vm832_vm0, %v1549_v43  ;;  %v3419_v43 = vld [vmem:[#allocation10 + $0xcc] ss:$16 sps:$4 sm:$0xff]  }
 0x7a7   : > { %3221 = vmatprep.mubr.msk.bf16.mxu1 %vm3882_vm1, %v3881_v36  ;;  %3218 = vmatpush3.bf16.msra.mxu1 %v3406_v2  ;;  %v3446_v2 = vld [vmem:[#allocation10 + $0x24] ss:$16 sps:$4 sm:$0xff]  }
 0x7a8   : > { %3219 = vmatprep.subr.bf16.mxu1 %v3881_v36  ;;  %v3407_v36 = vld [vmem:[#allocation7 + $0x30] sm:$0xff]  }
 0x7a9   : > { %v3209_v44 = vpop.f32.mrf.mxu0 }
 0x7aa   : > { %v1707_v45 = vsel %vm920_vm2, %v3209_v44, -inf }
 0x7ab   : > { %1708 = vmax.xlane.f32.xlu1 %v1707_v45  ;;  %v1695_v46 = vpop.f32.mrf.mxu0  ;;  %3220 = vmatpush3.bf16.msra.mxu1 %v3407_v36  ;;  %v3417_v45 = vld [vmem:[#allocation10 + $0xc8] ss:$16 sps:$4 sm:$0xff]  }
 0x7ac   : > { %v1704_v47 = vsel %vm920_vm2, %v1695_v46, -inf  ;;  %2187 = vmatprep.subr.bf16.mxu1 %v3413_v35  ;;  %v3462_v35 = vld [vmem:[#allocation13 + $0x30] sm:$0xff]  }
 0x7ad   : > { %1705 = vmax.xlane.f32.xlu0 %v1704_v47  ;;  %v3425_v47 = vld [vmem:[#allocation10 + $0xac] ss:$16 sps:$4 sm:$0xff]  }
 0x7bc   : > { %1728 = vrot.lane.b32.xlu1 %v4253_v5, %s3884_s11  ;;  %v1343_v5 = vadd.f32 %v4297_v59, %v4301_v1 }
 0x834   : > { %v1709_v48 = vpop.xlane.xlu1 %1708 }
 0x835   : > { %v1711_v49 = vsub.f32 %v3209_v44, %v1709_v48  ;;  %v3414_v44 = vld [vmem:[#allocation10 + $0xc0] ss:$16 sps:$4 sm:$0xff]  }
 0x836   : > { %v1706_v50 = vpop.xlane.xlu0 %1705  ;;  %v3420_v48 = vld [vmem:[#allocation10 + $0xa0] ss:$16 sps:$4 sm:$0xff]  }
 0x837   : > { %v1714_v51 = vmul.f32 1.442695, %v1711_v49  ;;  %v1710_v52 = vsub.f32 %v1695_v46, %v1706_v50  ;;  %v3422_v46 = vld [vmem:[#allocation10 + $0xa4] ss:$16 sps:$4 sm:$0xff]   ;;  %v3423_v49 = vld [vmem:[#allocation10 + $0xa8] ss:$16 sps:$4 sm:$0xff]  }
 0x838   : > { %v1729_v53 = vpop.permute.xlu1 %1728  ;;  %v3426_v50 = vld [vmem:[#allocation10 + $0x80] ss:$16 sps:$4 sm:$0xff]  }
 0x839   : > { %3512 = vpow2.f32 %v1714_v51  ;;  %v1712_v54 = vmul.f32 1.442695, %v1710_v52  ;;  %3210 = vmatprep.subr.mxu0 %v1729_v53  ;;  %v3428_v51 = vld [vmem:[#allocation10 + $0x84] ss:$16 sps:$4 sm:$0xff]   ;;  %v3429_v52 = vld [vmem:[#allocation10 + $0x88] ss:$16 sps:$4 sm:$0xff]  }
 0x83a   : > { %3211 = vmatpush3.msra.mxu0 %v1729_v53  ;;  %v3431_v53 = vld [vmem:[#allocation10 + $0x8c] ss:$16 sps:$4 sm:$0xff]  }
 0x83b   : > { %3514 = vpow2.f32 %v1712_v54  ;;  %v3434_v54 = vld [vmem:[#allocation10 + $0x64] ss:$16 sps:$4 sm:$0xff]  }
 0x846   : > { %v3513_v55 = vpop.eup %3512 }
 0x847   : > { %v1719_v56 = vsel %vm920_vm2, %v3513_v55, 0.0 }
 0x848   : > { %v3515_v57 = vpop.eup %3514  ;;  %1720 = vadd.xlane.f32.xlu0 %v1719_v56  ;;  %v3432_v56 = vld [vmem:[#allocation10 + $0x60] ss:$16 sps:$4 sm:$0xff]  }
 0x849   : > { %v1716_v58 = vsel %vm920_vm2, %v3515_v57, 0.0 }
 0x84c   : > { %1717 = vadd.xlane.f32.xlu0 %v1716_v58  ;;  %v3440_v58 = vld [vmem:[#allocation10 + $0x44] ss:$16 sps:$4 sm:$0xff]  }
 0x862   : > { %1726 = vrot.lane.b32.xlu0 %v4256_v9, %s3884_s11  ;;  %s4522_s11 = sld [smem:[#allocation30_spill]] }
 0x866   : > { %v1604_v60 = vpop.f32.mrf.mxu1 }
 0x867   : > { %v1611_v63 = vadd.f32 %v1604_v60, %v1343_v5  ;;  %v3443_v5 = vld [vmem:[#allocation10 + $0x4c] ss:$16 sps:$4 sm:$0xff]   ;;  %v3438_v60 = vld [vmem:[#allocation10 + $0x40] ss:$16 sps:$4 sm:$0xff]  }
 0x868   : > { %v3201_v4 = vpop.f32.mrf.mxu1  ;;  %s4422_s24 = scalar_lea.hbm %s4522_s11, %s3019_s21 }
 0x869   : > { %v3449_v4 = vld [vmem:[#allocation10 + $0x2c] ss:$16 sps:$4 sm:$0xff]  }
 0x86a   : > { %v1607_v7 = vpop.f32.mrf.mxu1 }
 0x86b   : > { %v1612_v8 = vadd.f32 %v1607_v7, %v1346_v6  ;;  %v3444_v6 = vld [vmem:[#allocation10 + $0x20] ss:$16 sps:$4 sm:$0xff]   ;;  %v3447_v7 = vld [vmem:[#allocation10 + $0x28] ss:$16 sps:$4 sm:$0xff]  }
 0x86c   : > { %v3202_v10 = vpop.f32.mrf.mxu1 }
 0x86d   : > { %v3455_v10 = vld [vmem:[#allocation10 + $0xc] ss:$16 sps:$4 sm:$0xff]  }
 0x8d1   : > { %v1721_v11 = vpop.xlane.xlu0 %1720 }
 0x8d2   : > { %3516 = vrcp.f32 %v1721_v11  ;;  %v3450_v11 = vld [vmem:[#allocation10] ss:$16 sps:$4 sm:$0xff]  }
 0x8d5   : > { %v1718_v12 = vpop.xlane.xlu0 %1717 }
 0x8d6   : > { %3518 = vrcp.f32 %v1718_v12  ;;  %v3453_v12 = vld [vmem:[#allocation10 + $0x8] ss:$16 sps:$4 sm:$0xff]  }
 0x8d9   : > { %v1727_v9 = vpop.permute.xlu0 %1726 }
 0x8da   : > { %3212 = vmatprep.subr.mxu0 %v1727_v9 }
 0x8db   : > { %3213 = vmatpush3.msra.mxu0 %v1727_v9 }
 0x8df   : > { %v3517_v59 = vpop.eup %3516 }
 0x8e0   : > { %v1725_v14 = vmul.f32 %v3517_v59, %v3513_v55  ;;  %v3437_v55 = vld [vmem:[#allocation10 + $0x6c] ss:$16 sps:$4 sm:$0xff]  }
 0x8e3   : > { %v3519_v1 = vpop.eup %3518 }
 0x8e4   : > { %v1724_v13 = vmul.f32 %v3519_v1, %v3515_v57  ;;  %v3435_v57 = vld [vmem:[#allocation10 + $0x68] ss:$16 sps:$4 sm:$0xff]  }
 0x8e6   : > { %3214 = vmatprep.mubr.msk.f32.mxu0 %vm920_vm2, %v1724_v13 }
 0x8e7   : > { %3215 = vmatmul.mubr.msk.f32.vlgmr.msra.gmra.mxu0 %vm920_vm2, %v1725_v14 }
 0x8e8   : > { %2176 = vmatprep.mubr.bf16.mxu0 %v3879_v0 }
 0x9a7   : > { %v3216_v61 = vpop.f32.mrf.mxu0 }
 0x9a9   : > { %v1804_v3 = vpop.f32.mrf.mxu0 }
 0x9aa   : > { %v1813_v15 = vpack.c.bf16 %v3216_v61, %v1804_v3 }
 0x9ac   : > { %3222 = vmatmul.mubr.msk.bf16.vlgmr.msra.gmra.mxu1 %vm832_vm0, %v1813_v15  ;;  %v2944_v15 = vld [vmem:[%s4472_s5] ss:$0 sm:$0xff] }
 0x9ad   : > { %2219 = vmatprep.mubr.bf16.mxu1 %v3879_v0  ;;  %v3410_v0 = vld [vmem:[#allocation10 + $0xe4] ss:$16 sps:$4 sm:$0xff]   ;;  %2188 = vmatpush1.bf16.msra.mxu1 %v3411_v32 }
 0x9ae   : > { %2144 = vmatprep.subr.bf16.mxu0 %v3410_v0  ;;  %2189 = vmatprep.subr.bf16.mxu1 %v3419_v43  ;;  %v3460_v0 = vld [vmem:[#allocation13 + $0x70] sm:$0xff]   ;;  %v3472_v43 = vld [vmem:[#allocation13 + $0x58] sm:$0xff]  }
 0x9af   : > { %2145 = vmatpush1.bf16.msra.mxu0 %v3408_v30  ;;  %v3459_v30 = vld [vmem:[#allocation13 + $0xb8] sm:$0xff]   ;;  %v3461_v32 = vld [vmem:[#allocation13 + $0xf0] sm:$0xff]  }
 0x9b0   : > { %2146 = vmatprep.subr.bf16.mxu0 %v3416_v42  ;;  %v3471_v42 = vld [vmem:[#allocation13 + $0xa0] sm:$0xff]  }
 0x9b1   : > { %2190 = vmatpush1.bf16.msra.mxu1 %v3417_v45  ;;  %v3474_v45 = vld [vmem:[#allocation13 + $0x18] sm:$0xff]  }
 0x9b2   : > { %2191 = vmatprep.subr.bf16.mxu1 %v3425_v47  ;;  %v3476_v47 = vld [vmem:[#allocation13 + $0x50] sm:$0xff]  }
 0x9b3   : > { %2147 = vmatpush1.bf16.msra.mxu0 %v3414_v44  ;;  %v3473_v44 = vld [vmem:[#allocation13 + $0xd8] sm:$0xff]  }
 0x9b4   : > { %2148 = vmatprep.subr.bf16.mxu0 %v3422_v46  ;;  %v3475_v46 = vld [vmem:[#allocation13 + $0x98] sm:$0xff]  }
 0x9b5   : > { %2192 = vmatpush1.bf16.msra.mxu1 %v3423_v49  ;;  %v3478_v49 = vld [vmem:[#allocation13 + $0x10] sm:$0xff]  }
 0x9b6   : > { %2193 = vmatprep.subr.bf16.mxu1 %v3431_v53  ;;  %v3482_v53 = vld [vmem:[#allocation13 + $0x8] sm:$0xff]  }
 0x9b7   : > { %2149 = vmatpush1.bf16.msra.mxu0 %v3420_v48  ;;  %v3477_v48 = vld [vmem:[#allocation13 + $0xd0] sm:$0xff]  }
 0x9b8   : > { %2150 = vmatprep.subr.bf16.mxu0 %v3428_v51  ;;  %v3480_v51 = vld [vmem:[#allocation13 + $0x48] sm:$0xff]  }
 0x9b9   : > { %2194 = vmatpush1.bf16.msra.mxu1 %v3429_v52  ;;  %v3481_v52 = vld [vmem:[#allocation13 + $0xc8] sm:$0xff]  }
 0x9ba   : > { %2195 = vmatprep.subr.bf16.mxu1 %v3437_v55  ;;  %v3484_v55 = vld [vmem:[#allocation13 + $0x40] sm:$0xff]  }
 0x9bb   : > { %2151 = vmatpush1.bf16.msra.mxu0 %v3426_v50  ;;  %v3479_v50 = vld [vmem:[#allocation13 + $0x90] sm:$0xff]  }
 0x9bc   : > { %2152 = vmatprep.subr.bf16.mxu0 %v3434_v54  ;;  %v3483_v54 = vld [vmem:[#allocation13 + $0x88] sm:$0xff]  }
 0x9bd   : > { %2196 = vmatpush1.bf16.msra.mxu1 %v3435_v57  ;;  %v3486_v57 = vld [vmem:[#allocation13] sm:$0xff]  }
 0x9be   : > { %2197 = vmatprep.subr.bf16.mxu1 %v3443_v5  ;;  %v1962_v5 = vld [vmem:[#allocation11] sm:$0xf] }
 0x9bf   : > { %2153 = vmatpush1.bf16.msra.mxu0 %v3432_v56  ;;  %v3485_v56 = vld [vmem:[#allocation13 + $0xc0] sm:$0xff]  }
 0x9c0   : > { %2154 = vmatprep.subr.bf16.mxu0 %v3440_v58  ;;  %v3487_v58 = vld [vmem:[#allocation13 + $0x80] sm:$0xff]  }
 0x9c3   : > { %2155 = vmatpush1.bf16.msra.mxu0 %v3438_v60  ;;  %v1978_v60 = vsub.s32 3, %v4183_v21 }
 0x9c4   : > { %2156 = vmatprep.subr.bf16.mxu0 %v3446_v2  ;;  %v1975_v2 = vrot.slane %v1962_v5, %v615_v62 }
 0x9c7   : > { %2157 = vmatpush1.bf16.msra.mxu0 %v3444_v6  ;;  %v1979_v6 = vrot.slane %v1962_v5, %v1978_v60 }
 0xa6c   : > { %v1868_v16 = vpop.f32.mrf.mxu1 }
 0xa6d   : > { %v1875_v20 = vadd.f32 %v1868_v16, %v1611_v63  ;;  %v3441_v63 = vld [vmem:[#allocation10 + $0x48] ss:$16 sps:$4 sm:$0xff]  }
 0xa6e   : > { %v3223_v33 = vpop.f32.mrf.mxu1  ;;  %2198 = vmatpush1.bf16.msra.mxu1 %v3441_v63  ;;  %v1967_v63 = vrot.slane %v1962_v5, %v607_v22 }
 0xa6f   : > { %v1884_v23 = vadd.f32 %v2943_v19, %v1875_v20  ;;  %2199 = vmatprep.subr.bf16.mxu1 %v3449_v4  ;;  %v2945_v33 = vld [vmem:[#allocation8] ss:$0 sm:$0xff]  ;;  %v1971_v4 = vrot.slane %v1962_v5, %v611_v27 }
 0xa70   : > { %v1871_v34 = vpop.f32.mrf.mxu1 }
 0xa71   : > { %v1876_v31 = vadd.f32 %v1871_v34, %v1612_v8  ;;  %v1886_v24 = vadd.f32 %v1884_v23, %v4176_v17  ;;  %v3452_v8 = vld [vmem:[#allocation10 + $0x4] ss:$16 sps:$4 sm:$0xff]  }
 0xa72   : > { %v3224_v25 = vpop.f32.mrf.mxu1  ;;  %2200 = vmatpush1.bf16.msra.mxu1 %v3447_v7  ;;  %2158 = vmatprep.subr.bf16.mxu0 %v3452_v8 }
 0xa73   : > { %v1885_v28 = vadd.f32 %v2943_v19, %v1876_v31  ;;  %1888 = vadd.xlane.f32.xlu1 %v1886_v24  ;;  %2201 = vmatprep.subr.bf16.mxu1 %v3455_v10  ;;  %v3456_v25 = vld [vmem:[#allocation13 + $0x78] sm:$0xff]  }
 0xa74   : > { %2159 = vmatpush1.bf16.msra.mxu0 %v3450_v11 }
 0xa75   : > { %v1887_v29 = vadd.f32 %v1885_v28, %v4179_v18  ;;  %v3457_v28 = vld [vmem:[#allocation13 + $0xf8] sm:$0xff]   ;;  %3073 = vmatprep.subr.bf16.mxu0 %v3456_v25 }
 0xa76   : > { %2202 = vmatpush1.bf16.msra.mxu1 %v3453_v12 }
 0xa77   : > { %1890 = vadd.xlane.f32.xlu0 %v1887_v29  ;;  %3095 = vmatprep.subr.bf16.mxu1 %v3457_v28 }
 0xafc   : > { %v1889_v37 = vpop.xlane.xlu1 %1888 }
 0xafd   : > { %v1893_v26 = vmul.f32 0.0078125, %v1889_v37  ;;  %v3463_v37 = vld [vmem:[#allocation13 + $0xb0] sm:$0xff]  }
 0xaff   : > { %v4357_v38 = vsub.f32 %v1886_v24, %v1893_v26  ;;  %v3464_v26 = vld [vmem:[#allocation13 + $0x68] sm:$0xff]  }
 0xb00   : > { %v1891_v39 = vpop.xlane.xlu0 %1890 }
 0xb01   : > { %v1894_v17 = vmul.f32 0.0078125, %v1891_v39  ;;  %v1897_v40 = vmul.f32 %v4357_v38, %v4357_v38  ;;  %v3466_v39 = vld [vmem:[#allocation13 + $0x28] sm:$0xff]  }
 0xb03   : > { %v4361_v41 = vsub.f32 %v1887_v29, %v1894_v17  ;;  %1899 = vadd.xlane.f32.xlu1 %v1897_v40  ;;  %v3458_v29 = vld [vmem:[#allocation13 + $0x38] sm:$0xff]   ;;  %v3467_v17 = vld [vmem:[#allocation13 + $0xa8] sm:$0xff]   ;;  %v3468_v40 = vld [vmem:[#allocation13 + $0x60] sm:$0xff]  }
 0xb05   : > { %v1898_v18 = vmul.f32 %v4361_v41, %v4361_v41 }
 0xb07   : > { %1901 = vadd.xlane.f32.xlu0 %v1898_v18  ;;  %v3470_v18 = vld [vmem:[#allocation13 + $0x20] sm:$0xff]  }
 0xb8c   : > { %v1900_v9 = vpop.xlane.xlu1 %1899 }
 0xb8d   : > { %v1903_v59 = vmul.f32 0.0078125, %v1900_v9 }
 0xb8f   : > { %v1905_v1 = vadd.f32 1e-05, %v1903_v59 }
 0xb90   : > { %v1902_v13 = vpop.xlane.xlu0 %1901 }
 0xb91   : > { %3520 = vrsqrt.f32 %v1905_v1  ;;  %v1904_v14 = vmul.f32 0.0078125, %v1902_v13 }
 0xb93   : > { %v1906_v36 = vadd.f32 1e-05, %v1904_v14 }
 0xb95   : > { %3522 = vrsqrt.f32 %v1906_v36 }
 0xb9e   : > { %v3521_v61 = vpop.eup %3520 }
 0xb9f   : > { %v1909_v3 = vmul.f32 %v3521_v61, %v4357_v38  ;;  %v3465_v38 = vld [vmem:[#allocation13 + $0xe8] sm:$0xff]  }
 0xba1   : > { %v1918_v20 = vmul.f32 %v2944_v15, %v1909_v3 }
 0xba2   : > { %v3523_v16 = vpop.eup %3522 }
 0xba3   : > { %v1910_v19 = vmul.f32 %v3523_v16, %v4361_v41  ;;  %v4370_v34 = vadd.f32 %v2945_v33, %v1918_v20  ;;  %v3469_v41 = vld [vmem:[#allocation13 + $0xe0] sm:$0xff]  }
 0xba5   : > { %v1919_v23 = vmul.f32 %v2944_v15, %v1910_v19 }
 0xba7   : > { %v4372_v31 = vadd.f32 %v2945_v33, %v1919_v23 }
 0xba9   : > { %v1929_v24 = vpack.c.bf16 %v4372_v31, %v4370_v34 }
 0xbab   : > { %2177 = vmatmul.mubr.bf16.vlgmr.msra.gmra.mxu0 %v1929_v24  ;;  %2220 = vmatmul.mubr.bf16.vlgmr.msra.gmra.mxu1 %v1929_v24 }
 0xbac   : > { %3074 = vmatpush3.bf16.msra.mxu0 %v3458_v29  ;;  %3096 = vmatpush3.bf16.msra.mxu1 %v3459_v30 }
 0xbad   : > { %3075 = vmatprep.subr.bf16.mxu0 %v3460_v0  ;;  %3097 = vmatprep.subr.bf16.mxu1 %v3461_v32 }
 0xbb0   : > { %3076 = vmatpush3.bf16.msra.mxu0 %v3462_v35  ;;  %3098 = vmatpush3.bf16.msra.mxu1 %v3463_v37 }
 0xbb1   : > { %3077 = vmatprep.subr.bf16.mxu0 %v3464_v26  ;;  %3099 = vmatprep.subr.bf16.mxu1 %v3465_v38 }
 0xbb4   : > { %3078 = vmatpush3.bf16.msra.mxu0 %v3466_v39  ;;  %3100 = vmatpush3.bf16.msra.mxu1 %v3467_v17 }
 0xbb5   : > { %3079 = vmatprep.subr.bf16.mxu0 %v3468_v40  ;;  %3101 = vmatprep.subr.bf16.mxu1 %v3469_v41 }
 0xbb8   : > { %3080 = vmatpush3.bf16.msra.mxu0 %v3470_v18  ;;  %3102 = vmatpush3.bf16.msra.mxu1 %v3471_v42 }
 0xbb9   : > { %3081 = vmatprep.subr.bf16.mxu0 %v3472_v43  ;;  %3103 = vmatprep.subr.bf16.mxu1 %v3473_v44 }
 0xbbc   : > { %3082 = vmatpush3.bf16.msra.mxu0 %v3474_v45  ;;  %3104 = vmatpush3.bf16.msra.mxu1 %v3475_v46 }
 0xbbd   : > { %3083 = vmatprep.subr.bf16.mxu0 %v3476_v47  ;;  %3105 = vmatprep.subr.bf16.mxu1 %v3477_v48 }
 0xbc0   : > { %3084 = vmatpush3.bf16.msra.mxu0 %v3478_v49  ;;  %3106 = vmatpush3.bf16.msra.mxu1 %v3479_v50 }
 0xbc1   : > { %3085 = vmatprep.subr.bf16.mxu0 %v3480_v51  ;;  %3107 = vmatprep.subr.bf16.mxu1 %v3481_v52 }
 0xbc4   : > { %3086 = vmatpush3.bf16.msra.mxu0 %v3482_v53  ;;  %3108 = vmatpush3.bf16.msra.mxu1 %v3483_v54 }
 0xbc5   : > { %3087 = vmatprep.subr.bf16.mxu0 %v3484_v55  ;;  %3109 = vmatprep.subr.bf16.mxu1 %v3485_v56 }
 0xbc8   : > { %3088 = vmatpush3.bf16.msra.mxu0 %v3486_v57  ;;  %3110 = vmatpush3.bf16.msra.mxu1 %v3487_v58 }
 0xc6b   : > { %v2178_v7 = vpop.f32.mrf.mxu0  ;;  %v2221_v8 = vpop.f32.mrf.mxu1 }
 0xc6c   : > { %v4383_v10 = vadd.f32 %v2178_v7, %v1967_v63  ;;  %v4385_v11 = vadd.f32 %v2221_v8, %v1975_v2 }
 0xc6d   : > { %v2180_v12 = vpop.f32.mrf.mxu0  ;;  %v2223_v9 = vpop.f32.mrf.mxu1 }
 0xc6e   : > { %v2238_v59 = vmul.f32 0.044715, %v4383_v10  ;;  %v2240_v1 = vmul.f32 0.044715, %v4385_v11  ;;  %v2181_v22 = vadd.f32 %v2180_v12, %v1971_v4  ;;  %v4389_v13 = vadd.f32 %v2223_v9, %v1979_v6 }
 0xc6f   : > { %v2182_v62 = vpop.f32.mrf.mxu0  ;;  %v2225_v14 = vpop.f32.mrf.mxu1  ;;  %v2230_v12 = vmul.f32 0.5, %v4383_v10 }
 0xc70   : > { %v2246_v21 = vmul.f32 %v2238_v59, %v4383_v10  ;;  %v2248_v27 = vmul.f32 %v2240_v1, %v4385_v11  ;;  %v2239_v36 = vmul.f32 0.044715, %v2181_v22  ;;  %v2241_v61 = vmul.f32 0.044715, %v4389_v13 }
 0xc71   : > { %v2183_v3 = vadd.f32 %v2182_v62, %v1967_v63  ;;  %v4394_v15 = vadd.f32 %v2225_v14, %v1975_v2  ;;  %v2184_v16 = vpop.f32.mrf.mxu0  ;;  %v2227_v19 = vpop.f32.mrf.mxu1  ;;  %v2231_v7 = vmul.f32 0.5, %v2181_v22 }
 0xc72   : > { %v2254_v20 = vmul.f32 %v2246_v21, %v4383_v10  ;;  %v2256_v33 = vmul.f32 %v2248_v27, %v4385_v11  ;;  %v2247_v23 = vmul.f32 %v2239_v36, %v2181_v22  ;;  %v2249_v24 = vmul.f32 %v2241_v61, %v4389_v13 }
 0xc73   : > { %v2242_v25 = vmul.f32 0.044715, %v2183_v3  ;;  %v2244_v28 = vmul.f32 0.044715, %v4394_v15  ;;  %v2185_v29 = vadd.f32 %v2184_v16, %v1971_v4  ;;  %v2228_v30 = vadd.f32 %v2227_v19, %v1979_v6 }
 0xc74   : > { %v2262_v0 = vadd.f32 %v2254_v20, %v4383_v10  ;;  %v2264_v32 = vadd.f32 %v2256_v33, %v4385_v11  ;;  %v2255_v35 = vmul.f32 %v2247_v23, %v2181_v22  ;;  %v2257_v37 = vmul.f32 %v2249_v24, %v4389_v13 }
 0xc75   : > { %v2250_v26 = vmul.f32 %v2242_v25, %v2183_v3  ;;  %v2252_v38 = vmul.f32 %v2244_v28, %v4394_v15  ;;  %v2243_v39 = vmul.f32 0.044715, %v2185_v29  ;;  %v2245_v17 = vmul.f32 0.044715, %v2228_v30 }
 0xc76   : > { %v2270_v40 = vmul.f32 0.7978846, %v2262_v0  ;;  %v2272_v41 = vmul.f32 0.7978846, %v2264_v32  ;;  %v2263_v18 = vadd.f32 %v2255_v35, %v2181_v22  ;;  %v2265_v47 = vadd.f32 %v2257_v37, %v4389_v13 }
 0xc77   : > { %v2258_v42 = vmul.f32 %v2250_v26, %v2183_v3  ;;  %v2260_v43 = vmul.f32 %v2252_v38, %v4394_v15  ;;  %v2251_v44 = vmul.f32 %v2243_v39, %v2185_v29  ;;  %v2253_v45 = vmul.f32 %v2245_v17, %v2228_v30  ;;  %v2978_v38 = vld [vmem:[#allocation14] ss:$0 sm:$0xff] }
 0xc78   : > { %v2271_v46 = vmul.f32 0.7978846, %v2263_v18  ;;  %3524 = vtanh.f32 %v2270_v40  ;;  %v2273_v52 = vmul.f32 0.7978846, %v2265_v47  ;;  %v2234_v62 = vmul.f32 0.5, %v2183_v3 }
 0xc79   : > { %v2266_v48 = vadd.f32 %v2258_v42, %v2183_v3  ;;  %v2268_v49 = vadd.f32 %v2260_v43, %v4394_v15  ;;  %v2259_v50 = vmul.f32 %v2251_v44, %v2185_v29  ;;  %3526 = vtanh.f32 %v2272_v41 }
 0xc7a   : > { %v2261_v51 = vmul.f32 %v2253_v45, %v2228_v30  ;;  %3528 = vtanh.f32 %v2271_v46  ;;  %v2235_v36 = vmul.f32 0.5, %v2185_v29  ;;  %v2236_v16 = vmul.f32 0.5, %v4394_v15 }
 0xc7b   : > { %v2274_v53 = vmul.f32 0.7978846, %v2266_v48  ;;  %v2276_v54 = vmul.f32 0.7978846, %v2268_v49  ;;  %v2267_v55 = vadd.f32 %v2259_v50, %v2185_v29  ;;  %3530 = vtanh.f32 %v2273_v52 }
 0xc7c   : > { %v2269_v56 = vadd.f32 %v2261_v51, %v2228_v30  ;;  %v2233_v20 = vmul.f32 0.5, %v4389_v13  ;;  %v2237_v33 = vmul.f32 0.5, %v2228_v30  ;;  %v2232_v10 = vmul.f32 0.5, %v4385_v11 }
 0xc7d   : > { %3532 = vtanh.f32 %v2274_v53  ;;  %v2275_v57 = vmul.f32 0.7978846, %v2267_v55 }
 0xc7e   : > { %3534 = vtanh.f32 %v2276_v54  ;;  %v2277_v58 = vmul.f32 0.7978846, %v2269_v56 }
 0xc7f   : > { %3536 = vtanh.f32 %v2275_v57 }
 0xc80   : > { %3538 = vtanh.f32 %v2277_v58 }
 0xc85   : > { %v3525_v5 = vpop.eup %3524 }
 0xc86   : > { %v3527_v60 = vpop.eup %3526  ;;  %v2286_v14 = vadd.f32 1.0, %v3525_v5 }
 0xc87   : > { %v3529_v63 = vpop.eup %3528  ;;  %v2288_v19 = vadd.f32 1.0, %v3527_v60 }
 0xc88   : > { %v3531_v2 = vpop.eup %3530  ;;  %v2287_v8 = vadd.f32 1.0, %v3529_v63  ;;  %v2294_v32 = vmul.f32 %v2286_v14, %v2230_v12  ;;  %v3012_v12 = vld [vmem:[#allocation16] ss:$0 sm:$0xff] }
 0xc89   : > { %v2289_v1 = vadd.f32 1.0, %v3531_v2  ;;  %v2296_v37 = vmul.f32 %v2288_v19, %v2232_v10 }
 0xc8a   : > { %v3533_v4 = vpop.eup %3532  ;;  %v2295_v24 = vmul.f32 %v2287_v8, %v2231_v7  ;;  %v3011_v7 = vld [vmem:[%s4521_s23] ss:$0 sm:$0xff] }
 0xc8b   : > { %v3535_v6 = vpop.eup %3534  ;;  %v2290_v9 = vadd.f32 1.0, %v3533_v4  ;;  %v2297_v0 = vmul.f32 %v2289_v1, %v2233_v20 }
 0xc8c   : > { %v3537_v59 = vpop.eup %3536  ;;  %v2292_v21 = vadd.f32 1.0, %v3535_v6 }
 0xc8d   : > { %v3539_v27 = vpop.eup %3538  ;;  %v2291_v61 = vadd.f32 1.0, %v3537_v59  ;;  %v2298_v22 = vmul.f32 %v2290_v9, %v2234_v62 }
 0xc8e   : > { %v2293_v23 = vadd.f32 1.0, %v3539_v27  ;;  %v2300_v28 = vmul.f32 %v2292_v21, %v2236_v16 }
 0xc8f   : > { %v2299_v25 = vmul.f32 %v2291_v61, %v2235_v36  ;;  %v2302_v26 = vpack.c.bf16 %v2298_v22, %v2294_v32 }
 0xc90   : > { %v2301_v3 = vmul.f32 %v2293_v23, %v2237_v33  ;;  %v2304_v15 = vpack.c.bf16 %v2300_v28, %v2296_v37 }
 0xc91   : > { %v2303_v35 = vpack.c.bf16 %v2299_v25, %v2295_v24 }
 0xc92   : > { %v2305_v29 = vpack.c.bf16 %v2301_v3, %v2297_v0 }
 0xc93   : > { %2601 = vmatprep.mubr.bf16.mxu0 %v2303_v35 }
 0xc94   : > { %2642 = vmatprep.mubr.bf16.mxu1 %v2305_v29  ;;  %2602 = vmatmul.mubr.bf16.vlgmr.msra.gmra.mxu0 %v2302_v26 }
 0xc95   : > { %2643 = vmatmul.mubr.bf16.vlgmr.msra.gmra.mxu1 %v2304_v15 }
 0xd54   : > { %v3089_v13 = vpop.f32.mrf.mxu0 }
 0xd55   : > { %v3111_v30 = vpop.f32.mrf.mxu1 }
 0xd56   : > { %v3090_v39 = vpop.f32.mrf.mxu0 }
 0xd57   : > { %v3091_v17 = vadd.f32 %v3090_v39, %v3089_v13  ;;  %v3112_v40 = vpop.f32.mrf.mxu1 }
 0xd58   : > { %v3092_v11 = vpop.f32.mrf.mxu0  ;;  %v3113_v18 = vadd.f32 %v3112_v40, %v3111_v30 }
 0xd59   : > { %v2604_v41 = vadd.f32 %v3091_v17, %v2978_v38  ;;  %v3114_v42 = vpop.f32.mrf.mxu1 }
 0xd5a   : > { %v3093_v43 = vpop.f32.mrf.mxu0 }
 0xd5b   : > { %v2645_v44 = vadd.f32 %v3113_v18, %v2604_v41  ;;  %v3094_v45 = vadd.f32 %v3093_v43, %v3092_v11  ;;  %v3115_v46 = vpop.f32.mrf.mxu1 }
 0xd5c   : > { %v3116_v48 = vadd.f32 %v3115_v46, %v3114_v42 }
 0xd5d   : > { %v2607_v47 = vadd.f32 %v3094_v45, %v2978_v38  ;;  %v2651_v49 = vadd.f32 %v2645_v44, %v4370_v34 }
 0xd5f   : > { %v2648_v50 = vadd.f32 %v3116_v48, %v2607_v47  ;;  %2653 = vadd.xlane.f32.xlu1 %v2651_v49 }
 0xd61   : > { %v2652_v51 = vadd.f32 %v2648_v50, %v4372_v31 }
 0xd63   : > { %2655 = vadd.xlane.f32.xlu0 %v2652_v51 }
 0xde8   : > { %v2654_v52 = vpop.xlane.xlu1 %2653 }
 0xde9   : > { %v2657_v53 = vmul.f32 0.0078125, %v2654_v52 }
 0xdeb   : > { %v2659_v54 = vsub.f32 %v2651_v49, %v2657_v53 }
 0xdec   : > { %v2656_v55 = vpop.xlane.xlu0 %2655 }
 0xded   : > { %v2658_v56 = vmul.f32 0.0078125, %v2656_v55  ;;  %v2661_v57 = vmul.f32 %v2659_v54, %v2659_v54 }
 0xdef   : > { %v2660_v58 = vsub.f32 %v2652_v51, %v2658_v56  ;;  %2663 = vadd.xlane.f32.xlu1 %v2661_v57 }
 0xdf1   : > { %v2662_v5 = vmul.f32 %v2660_v58, %v2660_v58 }
 0xdf3   : > { %2665 = vadd.xlane.f32.xlu0 %v2662_v5 }
 0xe78   : > { %v2664_v60 = vpop.xlane.xlu1 %2663 }
 0xe79   : > { %v2667_v63 = vmul.f32 0.0078125, %v2664_v60 }
 0xe7b   : > { %v2669_v34 = vadd.f32 1e-05, %v2667_v63 }
 0xe7c   : > { %v2666_v2 = vpop.xlane.xlu0 %2665 }
 0xe7d   : > { %3540 = vrsqrt.f32 %v2669_v34  ;;  %v2668_v4 = vmul.f32 0.0078125, %v2666_v2 }
 0xe7f   : > { %v2670_v31 = vadd.f32 1e-05, %v2668_v4 }
 0xe81   : > { %3542 = vrsqrt.f32 %v2670_v31 }
 0xe8a   : > { %v3541_v6 = vpop.eup %3540 }
 0xe8b   : > { %v2673_v8 = vmul.f32 %v3541_v6, %v2659_v54 }
 0xe8d   : > { %v2682_v9 = vmul.f32 %v3011_v7, %v2673_v8 }
 0xe8e   : > { %v3543_v59 = vpop.eup %3542 }
 0xe8f   : > { %v2691_v1 = vadd.f32 %v3012_v12, %v2682_v9  ;;  %v2674_v62 = vmul.f32 %v3543_v59, %v2660_v58 }
 0xe91   : > { %v2683_v14 = vmul.f32 %v3011_v7, %v2674_v62  ;;  %2693 = vst [vmem:[%s566_s1] sm:$0xff] %v2691_v1 }
 0xe93   : > { %v2692_v21 = vadd.f32 %v3012_v12, %v2683_v14 }
 0xe95   : > { %2694 = vst [vmem:[%s566_s1 + $0x8] sm:$0xff] %v2692_v21 }
 0xe96   : > { %3793 = shalt.err (!%p3790_p2)
}
 0xe97   : > { %s3794_s7 = scalar_lea.hbm %s4422_s24, 256  ;;  %s3798_s21 = scalar_lea.hbm %s4522_s11, 512 }
 0xe98   : > { %p3795_p4 = scmp.ne.s32.totalorder %s4422_s24, %s3794_s7  ;;  %p3799_p10 = scmp.lt.s32.totalorder %s4422_s24, %s4522_s11 }
 0xe99   : > { %p3800_p1 = scmp.lt.s32.totalorder %s3798_s21, %s3794_s7 }
 0xe9a   : > { %p3796_p9 = pnand %p3795_p4, %p4523_p13 }
 0xe9b   : > { %p3801_p3 = por %p3800_p1, %p3799_p10 }
 0xe9c   : > { %p3797_p11 = pneg %p3796_p9 }
 0xe9e   : > { %p3802_p12 = pnand %p3801_p3, %p3797_p11 }
 0xea0   : > { %3805 = shalt.err (!%p3802_p12)
}
 0xea1   : > { %s3886_s15 = smov 128   ;;  %s3887_s22 = smov 8  }
 0xea2   : > { %3259 = dma.vmem_to_hbm [thread:$0]  (%p4523_p13), %s4424_s3, 256, %s4422_s24, %s2696_s16, %s3886_s15, %s3886_s15, %s3887_s22  }
 0xea3 PF: > { %s2724_s14 = sand.u32 1, %s3848_s25   ;;  %p4524_p5 = scmp.ne.s32.totalorder %s4509_s30, 0 }
 0xea4   : > { %p4525_p8 = scmp.ge.s32.totalorder %s3860_s28, 2  ;;  %s2725_s8 = scalar_lea.sflag [#allocation4], %s2724_s14 }
 0xea6   : > { %p3291_p7 = pnand %p4525_p8, %p4524_p5 }
 0xea8   : > { %p3292_p6 = pneg %p3291_p7 }
 0xeaa   : > { %3843 = dma.done.wait (%p3292_p6), %s2725_s8, 256  }
 0xeab   : > { %3845 = vsyncadd (%p3292_p6), %s2725_s8, 4294967040  ;;  %p30_p0 = scmp.ge.s32.totalorder %s4074_s18, 4   ;;  %s4526_s25 = smov %s3852_s26 }
 0xeac   : > { %s4527_s26 = smov %s3856_s27  ;;  %s4528_s27 = smov %s4085_s19 }
 0xead   : > { %s4529_s28 = smov %s4074_s18  ;;  %32 = sbr.rel (!%p30_p0) target bundleno = 17 (0x11), region = 152 }
 0xeb2   :  { %2730 = vsyncpa [#allocation3], 1 }
 0xeb3   :  { %2732 = vsyncpa [#allocation3 + $0x1], 1 }
 0xeb4   :  { %2733 = vsyncpa [#allocation6], 1 }
 0xeb5   :  { %2734 = vsyncpa [#allocation9], 1 }
 0xeb6   :  { %2735 = vsyncpa [#allocation12], 1 }
 0xeb7   :  { %2736 = vsyncpa [#allocation15], 1 }
 0xeb8   :  { %2737 = vsyncpa [#allocation4], 1 }
 0xeb9   :  { %2739 = vsyncpa [#allocation4 + $0x1], 1 }

</bundles_post_ra>
